<compile_context>
chip_gen: v6e
topology: v6e:2x2x1
jax: 0.10.0
libtpu: 0.0.40
codegen_flags: <defaults>
</compile_context>

<pallas_src>
import numpy as np
import jax
import jax.numpy as jnp
from jax.experimental import pallas as pl
from jax.experimental.pallas import tpu as pltpu


# ---------------------------------------------------------------------------
# Pallas kernel: full CBAM forward for a (BB, C, S) block of samples.
# ---------------------------------------------------------------------------
def cbam_kernel(x_ref, w1t_ref, w2t_ref, mmaxT_ref, mminT_ref, bias_ref, o_ref):
    x = x_ref[...]                                             # (BB, C, S) f32
    s = x.shape[2]

    # ---- channel attention: global avg pool -> fc1 -> relu -> fc2 -> sigmoid
    avg = jnp.sum(x, axis=2) * (1.0 / s)                       # (BB, C)  lane reduce
    h = jnp.dot(avg, w1t_ref[...],
                preferred_element_type=jnp.float32)            # (BB, Cr) tiny matmul
    h = jnp.maximum(h, 0.0)                                    # relu
    logits = jnp.dot(h, w2t_ref[...],
                     preferred_element_type=jnp.float32)       # (BB, C)
    ca = jax.nn.sigmoid(logits)                                # (BB, C)
    x_ca = x * ca[:, :, None]                                  # (BB, C, S)

    # ---- spatial attention: channel max/min -> 7x7x7 conv (2 MXU matmuls) -> sigmoid
    maxp = jnp.max(x_ca, axis=1)                               # (BB, S) f32, sublane reduce
    minp = jnp.min(x_ca, axis=1)                               # (BB, S) f32
    # bf16 operands, f32 accumulation; no lane concat on the critical path.
    conv = (jnp.dot(maxp.astype(jnp.bfloat16), mmaxT_ref[...],
                    preferred_element_type=jnp.float32)
            + jnp.dot(minp.astype(jnp.bfloat16), mminT_ref[...],
                      preferred_element_type=jnp.float32))     # (BB, S) f32
    conv = conv + bias_ref[0]                                  # scalar bias from SMEM
    sa = jax.nn.sigmoid(conv)                                  # (BB, S)

    # ---- CBAM.forward: out = x * (channel_att(x) * spatial_att)
    o_ref[...] = x * (x_ca * sa[:, None, :])                   # (BB, C, S)


# ---------------------------------------------------------------------------
# Conv3d (kernel=7, pad=3, stride=1) for one input channel as a dense (S, S)
# matrix, built with fully vectorized numpy (runs once at init, not per call).
#   M[out_voxel, in_voxel] = w[kd, kh, kw] for in = out + (k - pad), zero-padded.
# ---------------------------------------------------------------------------
def conv3d_to_matrix(w, D, H, W):
    w = np.asarray(w, np.float32)
    K = w.shape[0]
    pad = K // 2
    S = D * H * W

    d, h, x = np.meshgrid(np.arange(D), np.arange(H), np.arange(W), indexing="ij")
    d = d.reshape(-1)
    h = h.reshape(-1)
    x = x.reshape(-1)                                          # (S,)
    kd, kh, kw = np.meshgrid(np.arange(K), np.arange(K), np.arange(K), indexing="ij")
    kd = kd.reshape(-1)
    kh = kh.reshape(-1)
    kw = kw.reshape(-1)                                        # (K^3,)

    dd = d[:, None] + (kd - pad)[None, :]                      # (S, K^3)
    hh = h[:, None] + (kh - pad)[None, :]
    xx = x[:, None] + (kw - pad)[None, :]
    valid = (dd >= 0) & (dd < D) & (hh >= 0) & (hh < H) & (xx >= 0) & (xx < W)

    in_idx = np.where(valid, (dd * H + hh) * W + xx, 0)        # (S, K^3)
    out_idx = np.broadcast_to(((d * H + h) * W + x)[:, None], in_idx.shape)
    vals = np.where(valid, np.broadcast_to(w.reshape(-1)[None, :], in_idx.shape), 0.0)

    M = np.zeros((S, S), np.float32)
    np.add.at(M, (out_idx, in_idx), vals.astype(np.float32))
    return M


# ---------------------------------------------------------------------------
# Parameter preprocessing: done ONCE at init (hoisted out of the call path).
# ---------------------------------------------------------------------------
def cbam_prepare_params(w1, w2, w_sp, b_sp, D, H, W):
    w1t = jnp.asarray(w1, jnp.float32).T                       # (C, Cr) = W1^T
    w2t = jnp.asarray(w2, jnp.float32).T                       # (Cr, C) = W2^T
    # Transposed dense conv matrices, bf16 (MXU-native, half the HBM traffic).
    mmaxT = jnp.asarray(conv3d_to_matrix(np.asarray(w_sp[0]), D, H, W).T,
                        jnp.bfloat16)                          # (S, S)
    mminT = jnp.asarray(conv3d_to_matrix(np.asarray(w_sp[1]), D, H, W).T,
                        jnp.bfloat16)                          # (S, S)
    bias = jnp.asarray(b_sp, jnp.float32).reshape(1)           # (1,) scalar in SMEM
    return w1t, w2t, mmaxT, mminT, bias


def _pick_block_batch(B, C, S, budget_bytes=4 * 1024 * 1024):
    """Largest divisor of B whose (in + out, double-buffered) blocks fit the budget."""
    per_sample = C * S * 4                                     # f32 bytes / sample / buffer
    bb = max(1, min(B, budget_bytes // (4 * per_sample)))
    while B % bb:
        bb -= 1
    return bb


# ---------------------------------------------------------------------------
# Wrapper: pure-reshape layout + pallas_call
# ---------------------------------------------------------------------------
@jax.jit
def cbam_pallas_apply(x_ncdhw, w1t, w2t, mmaxT, mminT, bias):
    B, C, D, H, W = x_ncdhw.shape
    Cr = w1t.shape[1]
    S = D * H * W

    # layout: pure reshape, no transpose (S stays the fast/lane axis)
    x_cs = x_ncdhw.reshape(B, C, S)
    BB = _pick_block_batch(B, C, S)

    # Actual VMEM footprint + headroom (don't claim the whole VMEM on v7x).
    vmem_bytes = (4 * BB * C * S * 4                            # x + out, double-buffered
                  + 2 * (mmaxT.size + mminT.size) * 2           # bf16 conv matrices (x2 bufs)
                  + 2 * (w1t.size + w2t.size) * 4               # tiny MLP weights
                  + (4 << 20))                                  # compiler-scratch headroom
    vmem_limit = int(max(16 * 1024 * 1024, vmem_bytes))

    out = pl.pallas_call(
        cbam_kernel,
        out_shape=jax.ShapeDtypeStruct((B, C, S), jnp.float32),
        grid_spec=pltpu.PrefetchScalarGridSpec(
            num_scalar_prefetch=0,
            grid=(B // BB,),
            in_specs=[
                pl.BlockSpec((BB, C, S), lambda b: (b, 0, 0)),           # x block
                pl.BlockSpec((C, Cr), lambda b: (0, 0)),                 # W1^T (grid-invariant)
                pl.BlockSpec((Cr, C), lambda b: (0, 0)),                 # W2^T (grid-invariant)
                pl.BlockSpec((S, S), lambda b: (0, 0)),                  # Mmax^T bf16
                pl.BlockSpec((S, S), lambda b: (0, 0)),                  # Mmin^T bf16
                pl.BlockSpec(memory_space=pltpu.MemorySpace.SMEM),       # bias scalar
            ],
            out_specs=pl.BlockSpec((BB, C, S), lambda b: (b, 0, 0)),
        ),
        compiler_params=pltpu.CompilerParams(
            dimension_semantics=("parallel",),
            vmem_limit_bytes=vmem_limit,
        ),
    )(x_cs, w1t, w2t, mmaxT, mminT, bias)

    return out.reshape(B, C, D, H, W)


def cbam_pallas(x_ncdhw, w1, w2, w_sp, b_sp):
    B, C, D, H, W = x_ncdhw.shape
    params = cbam_prepare_params(w1, w2, w_sp, b_sp, D, H, W)
    return cbam_pallas_apply(x_ncdhw, *params)


# ---------------------------------------------------------------------------
# Pure-JAX reference (mirrors the PyTorch forward exactly, f32 everywhere)
# ---------------------------------------------------------------------------
def cbam_reference(x, w1, w2, w_sp, b_sp):
    avg = jnp.mean(x, axis=(2, 3, 4), keepdims=True)                    # (B,C,1,1,1)
    h = jnp.maximum(jnp.einsum("rc,bcijk->brijk", w1, avg), 0.0)
    ca = jax.nn.sigmoid(jnp.einsum("cr,brijk->bcijk", w2, h))
    x1 = x * ca
    mx = jnp.max(x1, axis=1, keepdims=True)
    mn = jnp.min(x1, axis=1, keepdims=True)
    cc = jnp.concatenate([mx, mn], axis=1)                              # (B,2,D,H,W)
    conv = jax.lax.conv_general_dilated(
        cc, w_sp[None], window_strides=(1, 1, 1),
        padding=[(3, 3), (3, 3), (3, 3)],
        dimension_numbers=("NCDHW", "OIDHW", "NCDHW")) + b_sp
    sa = jax.nn.sigmoid(conv)
    return x * (x1 * sa)


if __name__ == "__main__":
    B, C, D, H, W = 2, 16, 8, 8, 8
    reduction_ratio = 4
    Cr = C // reduction_ratio

    key = jax.random.PRNGKey(0)
    kx, k1, k2, k3, k4 = jax.random.split(key, 5)

    x = jax.random.normal(kx, (B, C, D, H, W), jnp.float32)
    # ChannelAttention: Conv3d(C, C//r, 1, bias=False) / Conv3d(C//r, C, 1, bias=False)
    w1 = 0.3 * jax.random.normal(k1, (Cr, C), jnp.float32)       # fc1 weight (Cr, C, 1,1,1)
    w2 = 0.3 * jax.random.normal(k2, (C, Cr), jnp.float32)       # fc2 weight (C, Cr, 1,1,1)
    # SpatialAttention: Conv3d(2, 1, 7, padding=3)  -> weight (1,2,7,7,7), bias (1,)
    w_sp = 0.1 * jax.random.normal(k3, (2, 7, 7, 7), jnp.float32)
    b_sp = 0.1 * jax.random.normal(k4, (), jnp.float32)

    ref = jax.block_until_ready(cbam_reference(x, w1, w2, w_sp, b_sp))

    out = cbam_pallas(x, w1, w2, w_sp, b_sp)
    out = jax.block_until_ready(out)

    max_err = float(jnp.max(jnp.abs(out - ref)))
    mean_err = float(jnp.mean(jnp.abs(out - ref)))
    assert out.shape == (B, C, D, H, W)
    # bf16 conv-weight/pool quantisation (f32 accumulation) introduces ~1e-2-level
    # worst-case abs error through the x^2-scaled output; mean error stays tiny.
    assert max_err < 5e-2, f"max abs error too large: {max_err}"
    assert mean_err < 3e-3, f"mean abs error too large: {mean_err}"

    print("KERNEL_OK")
</pallas_src>

<mosaic_0001>
module attributes {stable_mosaic.version = 11 : i64} {
  func.func @cbam_kernel(%arg0: i32, %arg1: memref<2x16x512xf32, #tpu.memory_space<vmem>>, %arg2: memref<16x4xf32, #tpu.memory_space<vmem>>, %arg3: memref<4x16xf32, #tpu.memory_space<vmem>>, %arg4: memref<512x512xbf16, #tpu.memory_space<vmem>>, %arg5: memref<512x512xbf16, #tpu.memory_space<vmem>>, %arg6: memref<1xf32, #tpu.memory_space<smem>>, %arg7: memref<2x16x512xf32, #tpu.memory_space<vmem>>) attributes {dimension_semantics = [#tpu.dimension_semantics<parallel>], iteration_bounds = array<i64: 1>, scalar_prefetch = 0 : i64, scratch_operands = 0 : i64, tpu.core_type = #tpu.core_type<tc>, window_params = [{transform_indices = @transform_0, window_bounds = array<i64: 2, 16, 512>}, {pipeline_mode = #tpu.pipeline_mode<synchronous>, transform_indices = @transform_1, window_bounds = array<i64: 16, 4>}, {pipeline_mode = #tpu.pipeline_mode<synchronous>, transform_indices = @transform_2, window_bounds = array<i64: 4, 16>}, {pipeline_mode = #tpu.pipeline_mode<synchronous>, transform_indices = @transform_3, window_bounds = array<i64: 512, 512>}, {pipeline_mode = #tpu.pipeline_mode<synchronous>, transform_indices = @transform_4, window_bounds = array<i64: 512, 512>}, {transform_indices = @transform_5, window_bounds = array<i64: 1>}, {transform_indices = @transform_6, window_bounds = array<i64: 2, 16, 512>}]} {
    %c0 = arith.constant 0 : index
    %c0_0 = arith.constant 0 : index
    %c0_1 = arith.constant 0 : index
    %0 = vector.load %arg1[%c0, %c0_0, %c0_1] : memref<2x16x512xf32, #tpu.memory_space<vmem>>, vector<2x16x512xf32>
    %cst = arith.constant dense<0.000000e+00> : vector<2x16xf32>
    %1 = vector.multi_reduction <add>, %0, %cst [2] : vector<2x16x512xf32> to vector<2x16xf32>
    %cst_2 = arith.constant 0.001953125 : f32
    %2 = vector.broadcast %cst_2 : f32 to vector<2x16xf32>
    %3 = arith.mulf %1, %2 : vector<2x16xf32>
    %c0_3 = arith.constant 0 : index
    %c0_4 = arith.constant 0 : index
    %4 = vector.load %arg2[%c0_3, %c0_4] : memref<16x4xf32, #tpu.memory_space<vmem>>, vector<16x4xf32>
    %cst_5 = arith.constant dense<0.000000e+00> : vector<2x4xf32>
    %5 = tpu.matmul %3, %4, %cst_5 {dimension_numbers = #tpu.dot_dimension_numbers<[1], [0], [0], [1], [0, 0, 1, 1], [], []>} : vector<2x16xf32>, vector<16x4xf32>, vector<2x4xf32> -> vector<2x4xf32>
    %cst_6 = arith.constant 0.000000e+00 : f32
    %6 = vector.broadcast %cst_6 : f32 to vector<2x4xf32>
    %7 = arith.maximumf %5, %6 : vector<2x4xf32>
    %c0_7 = arith.constant 0 : index
    %c0_8 = arith.constant 0 : index
    %8 = vector.load %arg3[%c0_7, %c0_8] : memref<4x16xf32, #tpu.memory_space<vmem>>, vector<4x16xf32>
    %cst_9 = arith.constant dense<0.000000e+00> : vector<2x16xf32>
    %9 = tpu.matmul %7, %8, %cst_9 {dimension_numbers = #tpu.dot_dimension_numbers<[1], [0], [0], [1], [0, 0, 1, 1], [], []>} : vector<2x4xf32>, vector<4x16xf32>, vector<2x16xf32> -> vector<2x16xf32>
    %10 = arith.negf %9 : vector<2x16xf32>
    %11 = math.exp %10 : vector<2x16xf32>
    %cst_10 = arith.constant 1.000000e+00 : f32
    %12 = vector.broadcast %cst_10 : f32 to vector<2x16xf32>
    %13 = arith.addf %12, %11 : vector<2x16xf32>
    %14 = arith.divf %12, %13 : vector<2x16xf32>
    %15 = vector.shape_cast %14 : vector<2x16xf32> to vector<2x16x1xf32>
    %16 = vector.broadcast %15 : vector<2x16x1xf32> to vector<2x16x512xf32>
    %17 = arith.mulf %0, %16 : vector<2x16x512xf32>
    %cst_11 = arith.constant dense<0xFF800000> : vector<2x512xf32>
    %18 = vector.multi_reduction <maximumf>, %17, %cst_11 [1] : vector<2x16x512xf32> to vector<2x512xf32>
    %cst_12 = arith.constant dense<0x7F800000> : vector<2x512xf32>
    %19 = vector.multi_reduction <minimumf>, %17, %cst_12 [1] : vector<2x16x512xf32> to vector<2x512xf32>
    %20 = arith.truncf %18 : vector<2x512xf32> to vector<2x512xbf16>
    %c0_13 = arith.constant 0 : index
    %c0_14 = arith.constant 0 : index
    %21 = vector.load %arg4[%c0_13, %c0_14] : memref<512x512xbf16, #tpu.memory_space<vmem>>, vector<512x512xbf16>
    %cst_15 = arith.constant dense<0.000000e+00> : vector<2x512xf32>
    %22 = tpu.matmul %20, %21, %cst_15 {dimension_numbers = #tpu.dot_dimension_numbers<[1], [0], [0], [1], [0, 0, 1, 1], [], []>} : vector<2x512xbf16>, vector<512x512xbf16>, vector<2x512xf32> -> vector<2x512xf32>
    %23 = arith.truncf %19 : vector<2x512xf32> to vector<2x512xbf16>
    %c0_16 = arith.constant 0 : index
    %c0_17 = arith.constant 0 : index
    %24 = vector.load %arg5[%c0_16, %c0_17] : memref<512x512xbf16, #tpu.memory_space<vmem>>, vector<512x512xbf16>
    %cst_18 = arith.constant dense<0.000000e+00> : vector<2x512xf32>
    %25 = tpu.matmul %23, %24, %cst_18 {dimension_numbers = #tpu.dot_dimension_numbers<[1], [0], [0], [1], [0, 0, 1, 1], [], []>} : vector<2x512xbf16>, vector<512x512xbf16>, vector<2x512xf32> -> vector<2x512xf32>
    %26 = arith.addf %22, %25 : vector<2x512xf32>
    %c0_19 = arith.constant 0 : index
    %27 = memref.load %arg6[%c0_19] : memref<1xf32, #tpu.memory_space<smem>>
    %28 = vector.broadcast %27 : f32 to vector<2x512xf32>
    %29 = arith.addf %26, %28 : vector<2x512xf32>
    %30 = arith.negf %29 : vector<2x512xf32>
    %31 = math.exp %30 : vector<2x512xf32>
    %cst_20 = arith.constant 1.000000e+00 : f32
    %32 = vector.broadcast %cst_20 : f32 to vector<2x512xf32>
    %33 = arith.addf %32, %31 : vector<2x512xf32>
    %34 = arith.divf %32, %33 : vector<2x512xf32>
    %35 = vector.shape_cast %34 : vector<2x512xf32> to vector<2x1x512xf32>
    %36 = vector.broadcast %35 : vector<2x1x512xf32> to vector<2x16x512xf32>
    %37 = arith.mulf %17, %36 : vector<2x16x512xf32>
    %38 = arith.mulf %0, %37 : vector<2x16x512xf32>
    %c0_21 = arith.constant 0 : index
    %c0_22 = arith.constant 0 : index
    %c0_23 = arith.constant 0 : index
    %39 = vector.load %arg7[%c0_21, %c0_22, %c0_23] : memref<2x16x512xf32, #tpu.memory_space<vmem>>, vector<2x16x512xf32>
    tpu.vector_store %arg7[%c0_21, %c0_22, %c0_23], %38 {strides = array<i32>} : memref<2x16x512xf32, #tpu.memory_space<vmem>>, vector<2x16x512xf32>,
    return
  }
  func.func @transform_0(%arg0: i32) -> (i32, i32, i32) {
    %c0_i32 = arith.constant 0 : i32
    %c0_i32_0 = arith.constant 0 : i32
    %c0_i32_1 = arith.constant 0 : i32
    return %arg0, %c0_i32, %c0_i32_0 : i32, i32, i32
  }
  func.func @transform_1(%arg0: i32) -> (i32, i32) {
    %c0_i32 = arith.constant 0 : i32
    %c0_i32_0 = arith.constant 0 : i32
    %c0_i32_1 = arith.constant 0 : i32
    return %c0_i32, %c0_i32_0 : i32, i32
  }
  func.func @transform_2(%arg0: i32) -> (i32, i32) {
    %c0_i32 = arith.constant 0 : i32
    %c0_i32_0 = arith.constant 0 : i32
    %c0_i32_1 = arith.constant 0 : i32
    return %c0_i32, %c0_i32_0 : i32, i32
  }
  func.func @transform_3(%arg0: i32) -> (i32, i32) {
    %c0_i32 = arith.constant 0 : i32
    %c0_i32_0 = arith.constant 0 : i32
    %c0_i32_1 = arith.constant 0 : i32
    return %c0_i32, %c0_i32_0 : i32, i32
  }
  func.func @transform_4(%arg0: i32) -> (i32, i32) {
    %c0_i32 = arith.constant 0 : i32
    %c0_i32_0 = arith.constant 0 : i32
    %c0_i32_1 = arith.constant 0 : i32
    return %c0_i32, %c0_i32_0 : i32, i32
  }
  func.func @transform_5(%arg0: i32) -> i32 {
    %c0_i32 = arith.constant 0 : i32
    %c0_i32_0 = arith.constant 0 : i32
    return %c0_i32 : i32
  }
  func.func @transform_6(%arg0: i32) -> (i32, i32, i32) {
    %c0_i32 = arith.constant 0 : i32
    %c0_i32_0 = arith.constant 0 : i32
    %c0_i32_1 = arith.constant 0 : i32
    return %arg0, %c0_i32, %c0_i32_0 : i32, i32, i32
  }
}

</mosaic_0001>

<bundles_post_ra>
// kernel: cbam_pallas_apply.1
= control target key start
LH: loop header
LB: loop body
LE: loop exit
PB: predicated region body
PF: predicated region fallthrough
CT: control target
= control target key end

     0   :  { %12 = vsyncpa [#allocation4], 0  ;;  %s3241_s21 = smov [#allocation3]   ;;  %s4021_s0 = inlined_call_operand.vmem [shape: f32[2,16,512], index: 0, kind: input, shape index: {}]   ;;  %s4022_s1 = inlined_call_operand.vmem [shape: f32[16,4], index: 1, kind: input, shape index: {}]   ;;  %s4023_s2 = inlined_call_operand.vmem [shape: f32[4,16], index: 2, kind: input, shape index: {}]   ;;  %s4024_s3 = inlined_call_operand.vmem [shape: bf16[512,512], index: 3, kind: input, shape index: {}]   ;;  %s4025_s4 = inlined_call_operand.hbm [shape: bf16[512,512], index: 4, kind: input, shape index: {}]   ;;  %s4026_s5 = inlined_call_operand.<no memory space> [shape: f32[1], index: 5, kind: input, shape index: {}]   ;;  %s4027_s6 = inlined_call_operand.vmem [shape: f32[2,16,512], index: 6, kind: output, shape index: {}]  }
   0x1   :  { %s26_s22 = sshll.u32 %s3241_s21, 4  ;;  %s27_s22 = int_to_ptr.vmem [resolvable:$true] %s26_s22 }
   0x2   :  { %s3227_s23 = scalar_lea.vmem %s27_s22, 16384  ;;  %p3232_p1 = scmp.lt.s32.totalorder %s27_s22, %s27_s22 }
   0x3   :  { %p3228_p0 = scmp.ne.s32.totalorder %s27_s22, %s3227_s23  ;;  %p3233_p2 = scmp.lt.s32.totalorder %s3227_s23, %s3227_s23 }
   0x5   :  { %p3234_p3 = por %p3233_p2, %p3232_p1 }
   0x7   :  { %p3235_p4 = pnand %p3234_p3, %p3228_p0 }
   0x9   :  { %3238 = shalt.err (!%p3235_p4)
}
   0xa   :  { %s3242_s24 = smov 256   ;;  %s3243_s25 = smov 16  }
   0xb   :  { %32 = dma.hbm_to_vmem [thread:$0]  %s4025_s4, 16384, %s27_s22, [#allocation4], %s3242_s24, %s3242_s24, %s3243_s25  }
   0xc   :  { %3239 = dma.done.wait [#allocation4], 16384  }
   0xd   :  { %3240 = vsyncadd [#allocation4], 4294950912  ;;  %v3288_v0 = vld [vmem:[%s4021_s0 + $0x40] sm:$0xff]  ;;  %v3293_v1 = vld [vmem:[%s4021_s0 + $0x48] sm:$0xff]  ;;  %v3244_v28 = vmov 0.0   ;;  %vm3245_vm0 = vmmov 0   ;;  %v84_v31 = vlaneseq }
   0xe   :  { %v3298_v2 = vld [vmem:[%s4021_s0 + $0x50] sm:$0xff]  ;;  %v3303_v3 = vld [vmem:[%s4021_s0 + $0x58] sm:$0xff]  ;;  %v64_v4 = vadd.f32 %v3293_v1, %v3288_v0  ;;  %v3310_v5 = vld [vmem:[%s4021_s0] sm:$0xff]  ;;  %2781 = vmatprep.subr.mxu0 %v3244_v28  ;;  %2788 = vmatprep.subr.mxu1 %v3244_v28  ;;  %vm95_vm1 = vcmask 130112   ;;  %vm106_vm2 = vcmask 1041409   ;;  %vm108_vm3 = vcmask 130048  }
   0xf   :  { %v3315_v6 = vld [vmem:[%s4021_s0 + $0x8] sm:$0xff]  ;;  %v3320_v7 = vld [vmem:[%s4021_s0 + $0x10] sm:$0xff]  ;;  %v3325_v8 = vld [vmem:[%s4021_s0 + $0x18] sm:$0xff]  ;;  %2785 = vmatprep.mubr.msk.f32.mxu0 %vm3245_vm0, %v3244_v28  ;;  %2790 = vmatprep.mubr.msk.f32.mxu1 %vm3245_vm0, %v3244_v28  ;;  %v85_v32 = vand.u32 127, %v84_v31  ;;  %v3387_v33 = vshrl.u32 %v84_v31, 7  ;;  %vm187_vm4 = vcmask 1043456  }
  0x10   :  { %v54_v9 = vadd.f32 %v3315_v6, %v3310_v5  ;;  %v3332_v10 = vld [vmem:[%s4021_s0 + $0x60] sm:$0xff]  ;;  %v65_v11 = vadd.f32 %v64_v4, %v3298_v2  ;;  %v3338_v12 = vld [vmem:[%s4021_s0 + $0x68] sm:$0xff]  ;;  %v3343_v13 = vld [vmem:[%s4021_s0 + $0x70] sm:$0xff]  ;;  %vm183_vm5 = vcmask 31744  }
  0x11   :  { %v3348_v14 = vld [vmem:[%s4021_s0 + $0x78] sm:$0xff]  ;;  %v69_v16 = vadd.f32 %v3338_v12, %v3332_v10  ;;  %v3356_v17 = vld [vmem:[%s4021_s0 + $0x20] sm:$0xff]  ;;  %v3361_v18 = vld [vmem:[%s4021_s0 + $0x28] sm:$0xff]  ;;  %v90_v34 = vadd.s32 4294967288, %v85_v32  ;;  %v88_v37 = vsub.s32 %v85_v32, %v3387_v33 }
  0x12   :  { %v55_v15 = vadd.f32 %v54_v9, %v3320_v7  ;;  %v3366_v19 = vld [vmem:[%s4021_s0 + $0x30] sm:$0xff]  ;;  %v66_v20 = vadd.f32 %v65_v11, %v3303_v3  ;;  %v3372_v21 = vld [vmem:[%s4021_s0 + $0x38] sm:$0xff]  ;;  %v59_v22 = vadd.f32 %v3361_v18, %v3356_v17  ;;  %v79_v29 = vld [vmem:[%s4022_s1 + $0x8] sm:$0xff] }
  0x13   :  { %v70_v24 = vadd.f32 %v69_v16, %v3343_v13  ;;  %v78_v30 = vld [vmem:[%s4022_s1] sm:$0xff]  ;;  %2782 = vmatpush3.msra.mxu0 %v79_v29  ;;  %v93_v39 = vsub.s32 %v90_v34, %v3387_v33 }
  0x14   :  { %v56_v23 = vadd.f32 %v55_v15, %v3325_v8  ;;  %67 = vadd.xlane.f32.xlu1 %v66_v20  ;;  %v60_v25 = vadd.f32 %v59_v22, %v3366_v19  ;;  %2783 = vmatprep.subr.mxu0 %v3244_v28  ;;  %v182_v52 = vld [vmem:[%s4023_s2] sm:$0xf]  ;;  %v2801_v57 = vld [vmem:[#allocation3 + $0xe4] ss:$16 sps:$4 sm:$0xff]  }
  0x15   :  { %v71_v26 = vadd.f32 %v70_v24, %v3348_v14  ;;  %2784 = vmatpush3.msra.mxu0 %v78_v30  ;;  %2789 = vmatpush3.msk.msra.mxu1 %vm187_vm4, %v182_v52  ;;  %v2799_v56 = vld [vmem:[#allocation3 + $0xe0] ss:$16 sps:$4 sm:$0xff]   ;;  %v2804_v59 = vld [vmem:[#allocation3 + $0x2e4] ss:$16 sps:$4 sm:$0xff]  }
  0x16   :  { %57 = vadd.xlane.f32.xlu0 %v56_v23  ;;  %v61_v27 = vadd.f32 %v60_v25, %v3372_v21  ;;  %v2802_v58 = vld [vmem:[#allocation3 + $0x2e0] ss:$16 sps:$4 sm:$0xff]   ;;  %v2807_v60 = vld [vmem:[#allocation3 + $0xc4] ss:$16 sps:$4 sm:$0xff]   ;;  %1357 = vmatprep.subr.bf16.mxu1 %v2801_v57  ;;  %v3400_v57 = vsub.s32 1, %v3387_v33 }
  0x17   :  { %v2810_v61 = vld [vmem:[#allocation3 + $0x2c4] ss:$16 sps:$4 sm:$0xff]   ;;  %1398 = vmatprep.subr.bf16.mxu0 %v2804_v59  ;;  %v2805_v62 = vld [vmem:[#allocation3 + $0xc0] ss:$16 sps:$4 sm:$0xff]  }
  0x18   :  { %72 = vadd.xlane.f32.xlu1 %v71_v26  ;;  %v2808_v63 = vld [vmem:[#allocation3 + $0x2c0] ss:$16 sps:$4 sm:$0xff]   ;;  %v2813_v4 = vld [vmem:[#allocation3 + $0xa4] ss:$16 sps:$4 sm:$0xff]  }
  0x19   :  { %v2816_v9 = vld [vmem:[#allocation3 + $0x2a4] ss:$16 sps:$4 sm:$0xff]   ;;  %v2811_v11 = vld [vmem:[#allocation3 + $0xa0] ss:$16 sps:$4 sm:$0xff]  }
  0x1a   :  { %62 = vadd.xlane.f32.xlu0 %v61_v27  ;;  %v2814_v15 = vld [vmem:[#allocation3 + $0x2a0] ss:$16 sps:$4 sm:$0xff]   ;;  %v2819_v16 = vld [vmem:[#allocation3 + $0x84] ss:$16 sps:$4 sm:$0xff]  }
  0x1b   :  { %v2822_v20 = vld [vmem:[#allocation3 + $0x284] ss:$16 sps:$4 sm:$0xff]   ;;  %v2817_v22 = vld [vmem:[#allocation3 + $0x80] ss:$16 sps:$4 sm:$0xff]  }
  0x1c   :  { %v2820_v23 = vld [vmem:[#allocation3 + $0x280] ss:$16 sps:$4 sm:$0xff]   ;;  %v2825_v24 = vld [vmem:[#allocation3 + $0x64] ss:$16 sps:$4 sm:$0xff]  }
  0x1d   :  { %v2828_v25 = vld [vmem:[#allocation3 + $0x264] ss:$16 sps:$4 sm:$0xff]   ;;  %v2823_v26 = vld [vmem:[#allocation3 + $0x60] ss:$16 sps:$4 sm:$0xff]  }
  0x1e   :  { %v2826_v27 = vld [vmem:[#allocation3 + $0x260] ss:$16 sps:$4 sm:$0xff]   ;;  %v2831_v28 = vld [vmem:[#allocation3 + $0x44] ss:$16 sps:$4 sm:$0xff]  }
  0x1f   :  { %v2834_v29 = vld [vmem:[#allocation3 + $0x244] ss:$16 sps:$4 sm:$0xff]   ;;  %v2829_v30 = vld [vmem:[#allocation3 + $0x40] ss:$16 sps:$4 sm:$0xff]  }
  0x20   :  { %v2832_v31 = vld [vmem:[#allocation3 + $0x240] ss:$16 sps:$4 sm:$0xff]   ;;  %v2837_v32 = vld [vmem:[#allocation3 + $0x24] ss:$16 sps:$4 sm:$0xff]  }
  0x21   :  { %v2840_v34 = vld [vmem:[#allocation3 + $0x224] ss:$16 sps:$4 sm:$0xff]   ;;  %v2853_v52 = vld [vmem:[#allocation3 + $0x1c0] ss:$16 sps:$4 sm:$0xff]  }
  0x22   :  { %v2864_v59 = vld [vmem:[#allocation3 + $0x3a4] ss:$16 sps:$4 sm:$0xff]  }
  0x9d   :  { %v68_v35 = vpop.xlane.xlu1 %67 }
  0x9e   :  { %v76_v38 = vmul.f32 0.001953125, %v68_v35  ;;  %v2835_v35 = vld [vmem:[#allocation3 + $0x20] ss:$16 sps:$4 sm:$0xff]  }
  0x9f   :  { %v58_v36 = vpop.xlane.xlu0 %57 }
  0xa0   :  { %v74_v40 = vmul.f32 0.001953125, %v58_v36  ;;  %v100_v45 = vrot.slane %v76_v38, %v88_v37  ;;  %v2838_v36 = vld [vmem:[#allocation3 + $0x220] ss:$16 sps:$4 sm:$0xff]   ;;  %v2846_v38 = vld [vmem:[#allocation3 + $0x204] ss:$16 sps:$4 sm:$0xff]  }
  0xa1   :  { %v73_v41 = vpop.xlane.xlu1 %72 }
  0xa2   :  { %v77_v42 = vmul.f32 0.001953125, %v73_v41  ;;  %v89_v47 = vrot.slane %v74_v40, %v88_v37  ;;  %v2843_v37 = vld [vmem:[#allocation3 + $0x4] ss:$16 sps:$4 sm:$0xff]   ;;  %v2844_v40 = vld [vmem:[#allocation3 + $0x200] ss:$16 sps:$4 sm:$0xff]  }
  0xa3   :  { %v63_v43 = vpop.xlane.xlu0 %62  ;;  %v2849_v41 = vld [vmem:[#allocation3 + $0x1e4] ss:$16 sps:$4 sm:$0xff]  }
  0xa4   :  { %v75_v44 = vmul.f32 0.001953125, %v63_v43  ;;  %v104_v46 = vrot.slane %v77_v42, %v93_v39  ;;  %v2852_v42 = vld [vmem:[#allocation3 + $0x3e4] ss:$16 sps:$4 sm:$0xff]   ;;  %v2847_v43 = vld [vmem:[#allocation3 + $0x1e0] ss:$16 sps:$4 sm:$0xff]  }
  0xa6   :  { %v94_v48 = vrot.slane %v75_v44, %v93_v39  ;;  %v105_v49 = vsel %vm95_vm1, %v104_v46, %v100_v45  ;;  %v2841_v39 = vld [vmem:[#allocation3] ss:$16 sps:$4 sm:$0xff]  }
  0xa7   :  { %v2850_v44 = vld [vmem:[#allocation3 + $0x3e0] ss:$16 sps:$4 sm:$0xff]  }
  0xa8   :  { %v96_v50 = vsel %vm95_vm1, %v94_v48, %v89_v47 }
  0xa9   :  { %v107_v51 = vsel %vm106_vm2, %v105_v49, %v96_v50  ;;  %v2855_v50 = vld [vmem:[#allocation3 + $0x1c4] ss:$16 sps:$4 sm:$0xff]  }
  0xaa   :  { %2786 = vmatmul.mubr.msk.f32.vlgmr.msra.gmra.mxu0 %vm108_vm3, %v107_v51  ;;  %v2858_v51 = vld [vmem:[#allocation3 + $0x3c4] ss:$16 sps:$4 sm:$0xff]  }
  0xab   :  { %1399 = vmatpush1.bf16.msra.mxu0 %v2802_v58  ;;  %v2861_v58 = vld [vmem:[#allocation3 + $0x1a4] ss:$16 sps:$4 sm:$0xff]  }
  0xac   :  { %1400 = vmatprep.subr.bf16.mxu0 %v2810_v61  ;;  %v2862_v61 = vld [vmem:[#allocation3 + $0x3a0] ss:$16 sps:$4 sm:$0xff]  }
  0xaf   :  { %1401 = vmatpush1.bf16.msra.mxu0 %v2808_v63  ;;  %v2867_v63 = vld [vmem:[#allocation3 + $0x184] ss:$16 sps:$4 sm:$0xff]  }
  0xb0   :  { %1402 = vmatprep.subr.bf16.mxu0 %v2816_v9  ;;  %v2865_v9 = vld [vmem:[#allocation3 + $0x180] ss:$16 sps:$4 sm:$0xff]  }
  0xb3   :  { %1403 = vmatpush1.bf16.msra.mxu0 %v2814_v15  ;;  %v2873_v15 = vld [vmem:[#allocation3 + $0x164] ss:$16 sps:$4 sm:$0xff]  }
  0xb4   :  { %1404 = vmatprep.subr.bf16.mxu0 %v2822_v20  ;;  %v2871_v20 = vld [vmem:[#allocation3 + $0x160] ss:$16 sps:$4 sm:$0xff]  }
  0xb7   :  { %1405 = vmatpush1.bf16.msra.mxu0 %v2820_v23  ;;  %v2879_v23 = vld [vmem:[#allocation3 + $0x144] ss:$16 sps:$4 sm:$0xff]  }
  0xb8   :  { %1406 = vmatprep.subr.bf16.mxu0 %v2828_v25  ;;  %v2877_v25 = vld [vmem:[#allocation3 + $0x140] ss:$16 sps:$4 sm:$0xff]  }
  0xbb   :  { %1407 = vmatpush1.bf16.msra.mxu0 %v2826_v27  ;;  %v2885_v27 = vld [vmem:[#allocation3 + $0x124] ss:$16 sps:$4 sm:$0xff]  }
  0xbc   :  { %1408 = vmatprep.subr.bf16.mxu0 %v2834_v29  ;;  %v2883_v29 = vld [vmem:[#allocation3 + $0x120] ss:$16 sps:$4 sm:$0xff]  }
  0xbf   :  { %1409 = vmatpush1.bf16.msra.mxu0 %v2832_v31  ;;  %v2891_v31 = vld [vmem:[#allocation3 + $0x104] ss:$16 sps:$4 sm:$0xff]  }
  0xc0   :  { %1410 = vmatprep.subr.bf16.mxu0 %v2840_v34  ;;  %v2889_v34 = vld [vmem:[#allocation3 + $0x100] ss:$16 sps:$4 sm:$0xff]  }
  0xc3   :  { %1411 = vmatpush1.bf16.msra.mxu0 %v2838_v36  ;;  %v2897_v36 = vld [vmem:[#allocation3 + $0xec] ss:$16 sps:$4 sm:$0xff]  }
  0xc4   :  { %1412 = vmatprep.subr.bf16.mxu0 %v2846_v38 }
  0xc7   :  { %1413 = vmatpush1.bf16.msra.mxu0 %v2844_v40 }
  0xc8   :  { %1414 = vmatprep.subr.bf16.mxu0 %v2852_v42 }
  0xcb   :  { %1415 = vmatpush2.bf16.msra.mxu0 %v2850_v44 }
  0xcc   :  { %1416 = vmatprep.subr.bf16.mxu0 %v2858_v51 }
 0x16a   :  { %v177_v53 = vpop.f32.mrf.mxu0 }
 0x16b   :  { %v181_v54 = vmax.f32 %v177_v53, 0.0  ;;  %v2856_v53 = vld [vmem:[#allocation3 + $0x3c0] ss:$16 sps:$4 sm:$0xff]  }
 0x16c   :  { %v2787_v55 = vpop.f32.mrf.mxu0  ;;  %1417 = vmatpush2.bf16.msra.mxu0 %v2856_v53 }
 0x16d   :  { %2791 = vmatmul.mubr.msk.f32.vlgmr.msra.gmra.mxu1 %vm183_vm5, %v181_v54  ;;  %v3396_v54 = vsub.s32 0, %v3387_v33  ;;  %1418 = vmatprep.subr.bf16.mxu0 %v2864_v59 }
 0x16e   :  { %1358 = vmatpush1.bf16.msra.mxu1 %v2799_v56 }
 0x16f   :  { %1359 = vmatprep.subr.bf16.mxu1 %v2807_v60  ;;  %v2859_v60 = vld [vmem:[#allocation3 + $0x1a0] ss:$16 sps:$4 sm:$0xff]  }
 0x170   :  { %1419 = vmatpush2.bf16.msra.mxu0 %v2862_v61 }
 0x172   :  { %1360 = vmatpush1.bf16.msra.mxu1 %v2805_v62 }
 0x173   :  { %1361 = vmatprep.subr.bf16.mxu1 %v2813_v4  ;;  %v2870_v4 = vld [vmem:[#allocation3 + $0x384] ss:$16 sps:$4 sm:$0xff]  }
 0x174   :  { %1420 = vmatprep.subr.bf16.mxu0 %v2870_v4 }
 0x176   :  { %1362 = vmatpush1.bf16.msra.mxu1 %v2811_v11  ;;  %v2868_v11 = vld [vmem:[#allocation3 + $0x380] ss:$16 sps:$4 sm:$0xff]  }
 0x177   :  { %1363 = vmatprep.subr.bf16.mxu1 %v2819_v16  ;;  %1421 = vmatpush2.bf16.msra.mxu0 %v2868_v11  ;;  %v2876_v16 = vld [vmem:[#allocation3 + $0x364] ss:$16 sps:$4 sm:$0xff]  }
 0x178   :  { %1422 = vmatprep.subr.bf16.mxu0 %v2876_v16 }
 0x17a   :  { %1364 = vmatpush1.bf16.msra.mxu1 %v2817_v22  ;;  %v2874_v22 = vld [vmem:[#allocation3 + $0x360] ss:$16 sps:$4 sm:$0xff]  }
 0x17b   :  { %1365 = vmatprep.subr.bf16.mxu1 %v2825_v24  ;;  %1423 = vmatpush2.bf16.msra.mxu0 %v2874_v22  ;;  %v2882_v24 = vld [vmem:[#allocation3 + $0x344] ss:$16 sps:$4 sm:$0xff]  }
 0x17c   :  { %1424 = vmatprep.subr.bf16.mxu0 %v2882_v24 }
 0x17e   :  { %1366 = vmatpush1.bf16.msra.mxu1 %v2823_v26  ;;  %v2880_v26 = vld [vmem:[#allocation3 + $0x340] ss:$16 sps:$4 sm:$0xff]  }
 0x17f   :  { %1367 = vmatprep.subr.bf16.mxu1 %v2831_v28  ;;  %v2888_v28 = vld [vmem:[#allocation3 + $0x324] ss:$16 sps:$4 sm:$0xff]   ;;  %1425 = vmatpush2.bf16.msra.mxu0 %v2880_v26 }
 0x180   :  { %1426 = vmatprep.subr.bf16.mxu0 %v2888_v28 }
 0x182   :  { %1368 = vmatpush1.bf16.msra.mxu1 %v2829_v30  ;;  %v2886_v30 = vld [vmem:[#allocation3 + $0x320] ss:$16 sps:$4 sm:$0xff]  }
 0x183   :  { %1369 = vmatprep.subr.bf16.mxu1 %v2837_v32  ;;  %v2894_v32 = vld [vmem:[#allocation3 + $0x304] ss:$16 sps:$4 sm:$0xff]   ;;  %1427 = vmatpush2.bf16.msra.mxu0 %v2886_v30 }
 0x184   :  { %1428 = vmatprep.subr.bf16.mxu0 %v2894_v32 }
 0x186   :  { %1370 = vmatpush1.bf16.msra.mxu1 %v2835_v35  ;;  %v2892_v35 = vld [vmem:[#allocation3 + $0x300] ss:$16 sps:$4 sm:$0xff]  }
 0x187   :  { %1371 = vmatprep.subr.bf16.mxu1 %v2843_v37  ;;  %1429 = vmatpush2.bf16.msra.mxu0 %v2892_v35  ;;  %v2900_v37 = vld [vmem:[#allocation3 + $0x2ec] ss:$16 sps:$4 sm:$0xff]  }
 0x188   :  { %1480 = vmatprep.subr.bf16.mxu0 %v2900_v37 }
 0x18a   :  { %1372 = vmatpush1.bf16.msra.mxu1 %v2841_v39 }
 0x18b   :  { %1373 = vmatprep.subr.bf16.mxu1 %v2849_v41 }
 0x18e   :  { %1374 = vmatpush2.bf16.msra.mxu1 %v2847_v43 }
 0x18f   :  { %1375 = vmatprep.subr.bf16.mxu1 %v2855_v50 }
 0x192   :  { %1376 = vmatpush2.bf16.msra.mxu1 %v2853_v52 }
 0x193   :  { %1377 = vmatprep.subr.bf16.mxu1 %v2861_v58 }
 0x196   :  { %1378 = vmatpush2.bf16.msra.mxu1 %v2859_v60 }
 0x197   :  { %1379 = vmatprep.subr.bf16.mxu1 %v2867_v63 }
 0x19a   :  { %1380 = vmatpush2.bf16.msra.mxu1 %v2865_v9 }
 0x19b   :  { %1381 = vmatprep.subr.bf16.mxu1 %v2873_v15 }
 0x19e   :  { %1382 = vmatpush2.bf16.msra.mxu1 %v2871_v20 }
 0x19f   :  { %1383 = vmatprep.subr.bf16.mxu1 %v2879_v23 }
 0x1a2   :  { %1384 = vmatpush2.bf16.msra.mxu1 %v2877_v25 }
 0x1a3   :  { %1385 = vmatprep.subr.bf16.mxu1 %v2885_v27 }
 0x1a6   :  { %1386 = vmatpush2.bf16.msra.mxu1 %v2883_v29 }
 0x1a7   :  { %1387 = vmatprep.subr.bf16.mxu1 %v2891_v31 }
 0x1aa   :  { %1388 = vmatpush2.bf16.msra.mxu1 %v2889_v34 }
 0x1ab   :  { %1439 = vmatprep.subr.bf16.mxu1 %v2897_v36 }
 0x22d   :  { %v257_v45 = vpop.f32.mrf.mxu1 }
 0x22e   :  { %v2515_v46 = vmul.f32 -1.442695, %v257_v45 }
 0x22f   :  { %v2792_v47 = vpop.f32.mrf.mxu1 }
 0x230   :  { %3183 = vpow2.f32 %v2515_v46 }
 0x23d   :  { %v3184_v48 = vpop.eup %3183 }
 0x23e   :  { %v264_v49 = vadd.f32 1.0, %v3184_v48 }
 0x240   :  { %3185 = vrcp.f32 %v264_v49 }
 0x24d   :  { %v3186_v55 = vpop.eup %3185 }
 0x24e   :  { %v270_v56 = vrot.slane %v3186_v55, %v3396_v54  ;;  %v281_v62 = vrot.slane %v3186_v55, %v3400_v57 }
 0x250   :  { %276 = vbcast.lane.b32.xlu1 %v270_v56, 264  ;;  %272 = vbcast.lane.b32.xlu0 %v270_v56, 256 }
 0x254   :  { %283 = vbcast.lane.b32.xlu1 %v281_v62, 256 }
 0x258   :  { %287 = vbcast.lane.b32.xlu1 %v281_v62, 264 }
 0x2c2   :  { %v277_v38 = vpop.permute.xlu1 %276  ;;  %v273_v39 = vpop.permute.xlu0 %272 }
 0x2c3   :  { %v3404_v40 = vmul.f32 %v277_v38, %v3356_v17  ;;  %v3407_v41 = vmul.f32 %v277_v38, %v3366_v19  ;;  %v3410_v42 = vmul.f32 %v273_v39, %v3310_v5  ;;  %v3413_v43 = vmul.f32 %v273_v39, %v3320_v7 }
 0x2c4   :  { %v3416_v44 = vmul.f32 %v277_v38, %v3361_v18  ;;  %v3419_v45 = vmul.f32 %v273_v39, %v3315_v6  ;;  %v3422_v46 = vmul.f32 %v277_v38, %v3372_v21  ;;  %v3425_v17 = vmul.f32 %v273_v39, %v3325_v8 }
 0x2c5   :  { %v361_v19 = vmin.f32 %v3410_v42, %v3404_v40  ;;  %v375_v5 = vmin.f32 %v3413_v43, %v3407_v41 }
 0x2c6   :  { %v284_v7 = vpop.permute.xlu1 %283  ;;  %v368_v18 = vmin.f32 %v3419_v45, %v3416_v44  ;;  %v382_v6 = vmin.f32 %v3425_v17, %v3422_v46 }
 0x2c7   :  { %v362_v47 = vrot.slane %v361_v19, 4  ;;  %v376_v48 = vrot.slane %v375_v5, 4  ;;  %v3436_v52 = vmul.f32 %v284_v7, %v3288_v0  ;;  %v3439_v53 = vmul.f32 %v284_v7, %v3293_v1 }
 0x2c8   :  { %v369_v50 = vrot.slane %v368_v18, 4  ;;  %v383_v51 = vrot.slane %v382_v6, 4  ;;  %v3448_v58 = vmul.f32 %v284_v7, %v3298_v2  ;;  %v3451_v59 = vmul.f32 %v284_v7, %v3303_v3 }
 0x2c9   :  { %v363_v49 = vmin.f32 %v361_v19, %v362_v47  ;;  %v377_v8 = vmin.f32 %v375_v5, %v376_v48 }
 0x2ca   :  { %v288_v21 = vpop.permute.xlu1 %287  ;;  %v370_v61 = vmin.f32 %v368_v18, %v369_v50  ;;  %v384_v2 = vmin.f32 %v382_v6, %v383_v51 }
 0x2cb   :  { %v3442_v55 = vmul.f32 %v288_v21, %v3332_v10  ;;  %v3445_v56 = vmul.f32 %v288_v21, %v3338_v12  ;;  %v3454_v60 = vmul.f32 %v288_v21, %v3343_v13  ;;  %v3457_v0 = vmul.f32 %v288_v21, %v3348_v14 }
 0x2cc   :  { %v364_v1 = vrot.slane %v363_v49, 2  ;;  %v378_v62 = vrot.slane %v377_v8, 2  ;;  %v371_v15 = vrot.slane %v370_v61, 2  ;;  %v385_v23 = vrot.slane %v384_v2, 2 }
 0x2cd   :  { %v389_v10 = vmin.f32 %v3436_v52, %v3442_v55  ;;  %v396_v12 = vmin.f32 %v3439_v53, %v3445_v56  ;;  %v403_v3 = vmin.f32 %v3448_v58, %v3454_v60  ;;  %v410_v13 = vmin.f32 %v3451_v59, %v3457_v0 }
 0x2ce   :  { %v365_v11 = vmin.f32 %v363_v49, %v364_v1  ;;  %v379_v22 = vmin.f32 %v377_v8, %v378_v62  ;;  %v372_v32 = vmin.f32 %v370_v61, %v371_v15  ;;  %v386_v37 = vmin.f32 %v384_v2, %v385_v23 }
 0x2cf   :  { %v390_v63 = vrot.slane %v389_v10, 4  ;;  %v397_v4 = vrot.slane %v396_v12, 4  ;;  %v404_v14 = vrot.slane %v403_v3, 4  ;;  %v411_v9 = vrot.slane %v410_v13, 4 }
 0x2d0   :  { %v366_v30 = vrot.slane %v365_v11, 1  ;;  %v380_v35 = vrot.slane %v379_v22, 1  ;;  %v373_v19 = vrot.slane %v372_v32, 1  ;;  %v387_v47 = vrot.slane %v386_v37, 1 }
 0x2d1   :  { %v391_v16 = vmin.f32 %v389_v10, %v390_v63  ;;  %v398_v20 = vmin.f32 %v396_v12, %v397_v4  ;;  %v405_v24 = vmin.f32 %v403_v3, %v404_v14  ;;  %v412_v25 = vmin.f32 %v410_v13, %v411_v9 }
 0x2d2   :  { %v374_v48 = vmin.f32 %v372_v32, %v373_v19  ;;  %v367_v21 = vmin.f32 %v365_v11, %v366_v30  ;;  %v388_v50 = vmin.f32 %v386_v37, %v387_v47  ;;  %v381_v51 = vmin.f32 %v379_v22, %v380_v35  ;;  %v2906_v35 = vld [vmem:[#allocation3 + $0x2cc] ss:$16 sps:$4 sm:$0xff]   ;;  %v2904_v37 = vld [vmem:[#allocation3 + $0x2c8] ss:$16 sps:$4 sm:$0xff]  }
 0x2d3   :  { %v392_v26 = vrot.slane %v391_v16, 2  ;;  %v399_v27 = vrot.slane %v398_v20, 2  ;;  %v406_v28 = vrot.slane %v405_v24, 2  ;;  %v413_v29 = vrot.slane %v412_v25, 2  ;;  %v2907_v19 = vld [vmem:[#allocation3 + $0xa8] ss:$16 sps:$4 sm:$0xff]  }
 0x2d4   :  { %v554_v61 = vpack.c.bf16 %v374_v48, %v374_v48  ;;  %v553_v12 = vpack.c.bf16 %v367_v21, %v367_v21  ;;  %v556_v2 = vpack.c.bf16 %v388_v50, %v388_v50  ;;  %v555_v13 = vpack.c.bf16 %v381_v51, %v381_v51  ;;  %v2918_v47 = vld [vmem:[#allocation3 + $0x28c] ss:$16 sps:$4 sm:$0xff]   ;;  %v2916_v48 = vld [vmem:[#allocation3 + $0x288] ss:$16 sps:$4 sm:$0xff]  }
 0x2d5   :  { %v393_v31 = vmin.f32 %v391_v16, %v392_v26  ;;  %v400_v34 = vmin.f32 %v398_v20, %v399_v27  ;;  %v407_v36 = vmin.f32 %v405_v24, %v406_v28  ;;  %v414_v38 = vmin.f32 %v412_v25, %v413_v29  ;;  %v2895_v27 = vld [vmem:[#allocation3 + $0xe8] ss:$16 sps:$4 sm:$0xff]   ;;  %v2924_v21 = vld [vmem:[#allocation3 + $0x26c] ss:$16 sps:$4 sm:$0xff]  }
 0x2d6   :  { %v698_v4 = vunpack.c.l.b16 %v554_v61  ;;  %v697_v9 = vunpack.c.l.b16 %v553_v12  ;;  %v700_v16 = vunpack.c.l.b16 %v556_v2  ;;  %v699_v11 = vunpack.c.l.b16 %v555_v13  ;;  %v2922_v50 = vld [vmem:[#allocation3 + $0x268] ss:$16 sps:$4 sm:$0xff]   ;;  %v2930_v51 = vld [vmem:[#allocation3 + $0x24c] ss:$16 sps:$4 sm:$0xff]  }
 0x2d7   :  { %v394_v39 = vrot.slane %v393_v31, 1  ;;  %v401_v5 = vrot.slane %v400_v34, 1  ;;  %v408_v7 = vrot.slane %v407_v36, 1  ;;  %v415_v18 = vrot.slane %v414_v38, 1  ;;  %v2928_v61 = vld [vmem:[#allocation3 + $0x248] ss:$16 sps:$4 sm:$0xff]  }
 0x2d8   :  { %v2936_v12 = vld [vmem:[#allocation3 + $0x22c] ss:$16 sps:$4 sm:$0xff]   ;;  %v2934_v2 = vld [vmem:[#allocation3 + $0x228] ss:$16 sps:$4 sm:$0xff]  }
 0x2d9   :  { %v402_v6 = vmin.f32 %v400_v34, %v401_v5  ;;  %v395_v49 = vmin.f32 %v393_v31, %v394_v39  ;;  %v416_v8 = vmin.f32 %v414_v38, %v415_v18  ;;  %v409_v1 = vmin.f32 %v407_v36, %v408_v7  ;;  %v2898_v31 = vld [vmem:[#allocation3 + $0x2e8] ss:$16 sps:$4 sm:$0xff]   ;;  %v2903_v34 = vld [vmem:[#allocation3 + $0xcc] ss:$16 sps:$4 sm:$0xff]  }
 0x2da   :  { %v2901_v36 = vld [vmem:[#allocation3 + $0xc8] ss:$16 sps:$4 sm:$0xff]   ;;  %v2909_v38 = vld [vmem:[#allocation3 + $0xac] ss:$16 sps:$4 sm:$0xff]  }
 0x2db   :  { %v558_v10 = vpack.c.bf16 %v402_v6, %v402_v6  ;;  %v557_v62 = vpack.c.bf16 %v395_v49, %v395_v49  ;;  %v560_v3 = vpack.c.bf16 %v416_v8, %v416_v8  ;;  %v559_v63 = vpack.c.bf16 %v409_v1, %v409_v1  ;;  %v2912_v39 = vld [vmem:[#allocation3 + $0x2ac] ss:$16 sps:$4 sm:$0xff]   ;;  %v2910_v5 = vld [vmem:[#allocation3 + $0x2a8] ss:$16 sps:$4 sm:$0xff]  }
 0x2dc   :  { %v2915_v7 = vld [vmem:[#allocation3 + $0x8c] ss:$16 sps:$4 sm:$0xff]   ;;  %v2913_v18 = vld [vmem:[#allocation3 + $0x88] ss:$16 sps:$4 sm:$0xff]  }
 0x2dd   :  { %v702_v14 = vunpack.c.l.b16 %v558_v10  ;;  %v701_v15 = vunpack.c.l.b16 %v557_v62  ;;  %v704_v20 = vunpack.c.l.b16 %v560_v3  ;;  %v703_v23 = vunpack.c.l.b16 %v559_v63  ;;  %v2921_v6 = vld [vmem:[#allocation3 + $0x6c] ss:$16 sps:$4 sm:$0xff]   ;;  %v2919_v49 = vld [vmem:[#allocation3 + $0x68] ss:$16 sps:$4 sm:$0xff]  }
 0x2de   :  { %v2927_v8 = vld [vmem:[#allocation3 + $0x4c] ss:$16 sps:$4 sm:$0xff]   ;;  %v2925_v1 = vld [vmem:[#allocation3 + $0x48] ss:$16 sps:$4 sm:$0xff]   ;;  %v340_v63 = vmax.f32 %v3439_v53, %v3445_v56 }
 0x2df   :  { %v706_v24 = vsel %vm106_vm2, %v702_v14, %v698_v4  ;;  %v705_v22 = vsel %vm106_vm2, %v701_v15, %v697_v9  ;;  %v708_v26 = vsel %vm106_vm2, %v704_v20, %v700_v16  ;;  %v707_v29 = vsel %vm106_vm2, %v703_v23, %v699_v11  ;;  %v2933_v10 = vld [vmem:[#allocation3 + $0x2c] ss:$16 sps:$4 sm:$0xff]   ;;  %v2931_v62 = vld [vmem:[#allocation3 + $0x28] ss:$16 sps:$4 sm:$0xff]  }
 0x2e0   :  { %v710_v25 = vpack.c.b16 %v706_v24, %v706_v24  ;;  %v3470_v28 = vpack.c.b16 %v705_v22, %v705_v22  ;;  %v712_v30 = vpack.c.b16 %v708_v26, %v708_v26  ;;  %v3473_v32 = vpack.c.b16 %v707_v29, %v707_v29  ;;  %v2939_v3 = vld [vmem:[#allocation3 + $0xc] ss:$16 sps:$4 sm:$0xff]   ;;  %v2937_v4 = vld [vmem:[#allocation3 + $0x8] ss:$16 sps:$4 sm:$0xff]  }
 0x2e1   :  { %v2942_v13 = vld [vmem:[#allocation3 + $0x20c] ss:$16 sps:$4 sm:$0xff]   ;;  %v354_v14 = vmax.f32 %v3451_v59, %v3457_v0  ;;  %v2940_v9 = vld [vmem:[#allocation3 + $0x208] ss:$16 sps:$4 sm:$0xff]   ;;  %v312_v16 = vmax.f32 %v3419_v45, %v3416_v44  ;;  %v326_v11 = vmax.f32 %v3425_v17, %v3422_v46  ;;  %v341_v23 = vrot.slane %v340_v63, 4 }
 0x2e2   :  { %1389 = vmatprep.mubr.bf16.mxu1 %v710_v25  ;;  %1430 = vmatprep.mubr.bf16.mxu0 %v712_v30  ;;  %v2945_v15 = vld [vmem:[#allocation3 + $0x1ec] ss:$16 sps:$4 sm:$0xff]   ;;  %v2943_v24 = vld [vmem:[#allocation3 + $0x1e8] ss:$16 sps:$4 sm:$0xff]  }
 0x2e3   :  { %1390 = vmatmul.mubr.bf16.vlgmr.msra.gmra.mxu1 %v3470_v28  ;;  %1431 = vmatmul.mubr.bf16.vlgmr.msra.gmra.mxu0 %v3473_v32  ;;  %v2948_v20 = vld [vmem:[#allocation3 + $0x3ec] ss:$16 sps:$4 sm:$0xff]   ;;  %v355_v22 = vrot.slane %v354_v14, 4 }
 0x2e4   :  { %1440 = vmatpush1.bf16.msra.mxu1 %v2895_v27  ;;  %1481 = vmatpush1.bf16.msra.mxu0 %v2898_v31  ;;  %v2951_v26 = vld [vmem:[#allocation3 + $0x1cc] ss:$16 sps:$4 sm:$0xff]   ;;  %v313_v27 = vrot.slane %v312_v16, 4  ;;  %v342_v31 = vmax.f32 %v340_v63, %v341_v23 }
 0x2e5   :  { %1471 = vmatprep.mubr.bf16.mxu1 %v710_v25  ;;  %1512 = vmatprep.mubr.bf16.mxu0 %v712_v30  ;;  %v2946_v25 = vld [vmem:[#allocation3 + $0x3e8] ss:$16 sps:$4 sm:$0xff]   ;;  %v2954_v29 = vld [vmem:[#allocation3 + $0x3cc] ss:$16 sps:$4 sm:$0xff]   ;;  %v327_v30 = vrot.slane %v326_v11, 4 }
 0x2e6   :  { %1441 = vmatprep.subr.bf16.mxu1 %v2903_v34  ;;  %1482 = vmatprep.subr.bf16.mxu0 %v2906_v35  ;;  %v2949_v34 = vld [vmem:[#allocation3 + $0x1c8] ss:$16 sps:$4 sm:$0xff]   ;;  %v356_v35 = vmax.f32 %v354_v14, %v355_v22  ;;  %v2975_v63 = vld [vmem:[#allocation3 + $0x14c] ss:$16 sps:$4 sm:$0xff]  }
 0x2e7   :  { %v2978_v14 = vld [vmem:[#allocation3 + $0x34c] ss:$16 sps:$4 sm:$0xff]  }
 0x2e8   :  { %1442 = vmatpush1.bf16.msra.mxu1 %v2901_v36  ;;  %1483 = vmatpush1.bf16.msra.mxu0 %v2904_v37  ;;  %v2952_v36 = vld [vmem:[#allocation3 + $0x3c8] ss:$16 sps:$4 sm:$0xff]   ;;  %v2957_v37 = vld [vmem:[#allocation3 + $0x1ac] ss:$16 sps:$4 sm:$0xff]  }
 0x2e9   :  { %1443 = vmatprep.subr.bf16.mxu1 %v2909_v38  ;;  %1484 = vmatprep.subr.bf16.mxu0 %v2912_v39  ;;  %v314_v38 = vmax.f32 %v312_v16, %v313_v27  ;;  %v2960_v39 = vld [vmem:[#allocation3 + $0x3ac] ss:$16 sps:$4 sm:$0xff]   ;;  %v2973_v16 = vld [vmem:[#allocation3 + $0x148] ss:$16 sps:$4 sm:$0xff]  }
 0x2ea   :  { %v2981_v23 = vld [vmem:[#allocation3 + $0x12c] ss:$16 sps:$4 sm:$0xff]   ;;  %v2979_v27 = vld [vmem:[#allocation3 + $0x128] ss:$16 sps:$4 sm:$0xff]  }
 0x2eb   :  { %v2984_v22 = vld [vmem:[#allocation3 + $0x32c] ss:$16 sps:$4 sm:$0xff]  }
 0x2ec   :  { %1444 = vmatpush1.bf16.msra.mxu1 %v2907_v19  ;;  %1485 = vmatpush1.bf16.msra.mxu0 %v2910_v5  ;;  %v328_v19 = vmax.f32 %v326_v11, %v327_v30  ;;  %v343_v5 = vrot.slane %v342_v31, 2  ;;  %v2976_v11 = vld [vmem:[#allocation3 + $0x348] ss:$16 sps:$4 sm:$0xff]  }
 0x2ed   :  { %1445 = vmatprep.subr.bf16.mxu1 %v2915_v7  ;;  %1486 = vmatprep.subr.bf16.mxu0 %v2918_v47  ;;  %v2955_v7 = vld [vmem:[#allocation3 + $0x1a8] ss:$16 sps:$4 sm:$0xff]   ;;  %v357_v47 = vrot.slane %v356_v35, 2 }
 0x2ee   :  { %v2982_v30 = vld [vmem:[#allocation3 + $0x328] ss:$16 sps:$4 sm:$0xff]  }
 0x2f0   :  { %1446 = vmatpush1.bf16.msra.mxu1 %v2913_v18  ;;  %1487 = vmatpush1.bf16.msra.mxu0 %v2916_v48  ;;  %v2958_v18 = vld [vmem:[#allocation3 + $0x3a8] ss:$16 sps:$4 sm:$0xff]   ;;  %v2963_v48 = vld [vmem:[#allocation3 + $0x18c] ss:$16 sps:$4 sm:$0xff]  }
 0x2f1   :  { %1447 = vmatprep.subr.bf16.mxu1 %v2921_v6  ;;  %1488 = vmatprep.subr.bf16.mxu0 %v2924_v21  ;;  %v315_v6 = vrot.slane %v314_v38, 2  ;;  %v2966_v21 = vld [vmem:[#allocation3 + $0x38c] ss:$16 sps:$4 sm:$0xff]  }
 0x2f4   :  { %1448 = vmatpush1.bf16.msra.mxu1 %v2919_v49  ;;  %1489 = vmatpush1.bf16.msra.mxu0 %v2922_v50  ;;  %v329_v49 = vrot.slane %v328_v19, 2  ;;  %v2961_v50 = vld [vmem:[#allocation3 + $0x188] ss:$16 sps:$4 sm:$0xff]  }
 0x2f5   :  { %1449 = vmatprep.subr.bf16.mxu1 %v2927_v8  ;;  %1490 = vmatprep.subr.bf16.mxu0 %v2930_v51  ;;  %v344_v8 = vmax.f32 %v342_v31, %v343_v5  ;;  %v2964_v51 = vld [vmem:[#allocation3 + $0x388] ss:$16 sps:$4 sm:$0xff]   ;;  %v2987_v31 = vld [vmem:[#allocation3 + $0x10c] ss:$16 sps:$4 sm:$0xff]   ;;  %v2993_v5 = vld [vmem:[%s4024_s3 + $0xe4] ss:$16 sps:$4 sm:$0xff]  }
 0x2f8   :  { %1450 = vmatpush1.bf16.msra.mxu1 %v2925_v1  ;;  %1491 = vmatpush1.bf16.msra.mxu0 %v2928_v61  ;;  %v2969_v1 = vld [vmem:[#allocation3 + $0x16c] ss:$16 sps:$4 sm:$0xff]   ;;  %v358_v61 = vmax.f32 %v356_v35, %v357_v47  ;;  %v2996_v47 = vld [vmem:[%s4024_s3 + $0x2e4] ss:$16 sps:$4 sm:$0xff]  }
 0x2f9   :  { %1451 = vmatprep.subr.bf16.mxu1 %v2933_v10  ;;  %1492 = vmatprep.subr.bf16.mxu0 %v2936_v12  ;;  %v2972_v10 = vld [vmem:[#allocation3 + $0x36c] ss:$16 sps:$4 sm:$0xff]   ;;  %v316_v12 = vmax.f32 %v314_v38, %v315_v6  ;;  %v2985_v38 = vld [vmem:[#allocation3 + $0x108] ss:$16 sps:$4 sm:$0xff]   ;;  %v2991_v6 = vld [vmem:[%s4024_s3 + $0xe0] ss:$16 sps:$4 sm:$0xff]  }
 0x2fa   :  { %v2990_v35 = vld [vmem:[#allocation3 + $0x30c] ss:$16 sps:$4 sm:$0xff]  }
 0x2fc   :  { %1452 = vmatpush1.bf16.msra.mxu1 %v2931_v62  ;;  %1493 = vmatpush1.bf16.msra.mxu0 %v2934_v2  ;;  %v330_v62 = vmax.f32 %v328_v19, %v329_v49  ;;  %v2967_v2 = vld [vmem:[#allocation3 + $0x168] ss:$16 sps:$4 sm:$0xff]   ;;  %v2994_v49 = vld [vmem:[%s4024_s3 + $0x2e0] ss:$16 sps:$4 sm:$0xff]  }
 0x2fd   :  { %1453 = vmatprep.subr.bf16.mxu1 %v2939_v3  ;;  %1494 = vmatprep.subr.bf16.mxu0 %v2942_v13  ;;  %v345_v3 = vrot.slane %v344_v8, 1  ;;  %v2970_v13 = vld [vmem:[#allocation3 + $0x368] ss:$16 sps:$4 sm:$0xff]  }
 0x2fe   :  { %v2988_v19 = vld [vmem:[#allocation3 + $0x308] ss:$16 sps:$4 sm:$0xff]  }
 0x300   :  { %1454 = vmatpush1.bf16.msra.mxu1 %v2937_v4  ;;  %1495 = vmatpush1.bf16.msra.mxu0 %v2940_v9  ;;  %v359_v4 = vrot.slane %v358_v61, 1  ;;  %v317_v9 = vrot.slane %v316_v12, 1 }
 0x301   :  { %1455 = vmatprep.subr.bf16.mxu1 %v2945_v15  ;;  %1496 = vmatprep.subr.bf16.mxu0 %v2948_v20  ;;  %v331_v15 = vrot.slane %v330_v62, 1  ;;  %v346_v20 = vmax.f32 %v344_v8, %v345_v3  ;;  %v2999_v8 = vld [vmem:[%s4024_s3 + $0xc4] ss:$16 sps:$4 sm:$0xff]  }
 0x302   :  { %v3011_v3 = vld [vmem:[%s4024_s3 + $0x84] ss:$16 sps:$4 sm:$0xff]  }
 0x304   :  { %1456 = vmatpush2.bf16.msra.mxu1 %v2943_v24  ;;  %1497 = vmatpush2.bf16.msra.mxu0 %v2946_v25  ;;  %v360_v24 = vmax.f32 %v358_v61, %v359_v4  ;;  %v318_v25 = vmax.f32 %v316_v12, %v317_v9  ;;  %v3005_v12 = vld [vmem:[%s4024_s3 + $0xa4] ss:$16 sps:$4 sm:$0xff]   ;;  %v3012_v4 = vld [vmem:[%s4024_s3 + $0x280] ss:$16 sps:$4 sm:$0xff]  }
 0x305   :  { %1457 = vmatprep.subr.bf16.mxu1 %v2951_v26  ;;  %1498 = vmatprep.subr.bf16.mxu0 %v2954_v29  ;;  %v332_v26 = vmax.f32 %v330_v62, %v331_v15  ;;  %v422_v29 = vpack.c.bf16 %v346_v20, %v346_v20  ;;  %v3003_v62 = vld [vmem:[%s4024_s3 + $0xa0] ss:$16 sps:$4 sm:$0xff]   ;;  %v3020_v9 = vld [vmem:[%s4024_s3 + $0x264] ss:$16 sps:$4 sm:$0xff]  }
 0x306   :  { %v3015_v15 = vld [vmem:[%s4024_s3 + $0x60] ss:$16 sps:$4 sm:$0xff]   ;;  %v3023_v20 = vld [vmem:[%s4024_s3 + $0x44] ss:$16 sps:$4 sm:$0xff]  }
 0x308   :  { %1458 = vmatpush2.bf16.msra.mxu1 %v2949_v34  ;;  %1499 = vmatpush2.bf16.msra.mxu0 %v2952_v36  ;;  %v424_v34 = vpack.c.bf16 %v360_v24, %v360_v24  ;;  %v418_v36 = vpack.c.bf16 %v318_v25, %v318_v25  ;;  %v3024_v24 = vld [vmem:[%s4024_s3 + $0x240] ss:$16 sps:$4 sm:$0xff]   ;;  %v3032_v25 = vld [vmem:[%s4024_s3 + $0x224] ss:$16 sps:$4 sm:$0xff]  }
 0x309   :  { %1459 = vmatprep.subr.bf16.mxu1 %v2957_v37  ;;  %1500 = vmatprep.subr.bf16.mxu0 %v2960_v39  ;;  %v420_v37 = vpack.c.bf16 %v332_v26, %v332_v26  ;;  %v1534_v39 = vunpack.c.l.b16 %v422_v29  ;;  %v3027_v26 = vld [vmem:[%s4024_s3 + $0x20] ss:$16 sps:$4 sm:$0xff]   ;;  %v3035_v29 = vld [vmem:[%s4024_s3 + $0x4] ss:$16 sps:$4 sm:$0xff]  }
 0x30c   :  { %1460 = vmatpush2.bf16.msra.mxu1 %v2955_v7  ;;  %1501 = vmatpush2.bf16.msra.mxu0 %v2958_v18  ;;  %v1536_v7 = vunpack.c.l.b16 %v424_v34  ;;  %v1530_v18 = vunpack.c.l.b16 %v418_v36  ;;  %v347_v34 = vmax.f32 %v3448_v58, %v3454_v60  ;;  %v3033_v36 = vld [vmem:[%s4024_s3] ss:$16 sps:$4 sm:$0xff]  }
 0x30d   :  { %1461 = vmatprep.subr.bf16.mxu1 %v2963_v48  ;;  %1502 = vmatprep.subr.bf16.mxu0 %v2966_v21  ;;  %v1532_v48 = vunpack.c.l.b16 %v420_v37  ;;  %v319_v37 = vmax.f32 %v3413_v43, %v3407_v41 }
 0x30e   :  { %v1538_v21 = vsel %vm106_vm2, %v1534_v39, %v1530_v18  ;;  %v3041_v39 = vld [vmem:[%s4024_s3 + $0x1e4] ss:$16 sps:$4 sm:$0xff]   ;;  %v3039_v18 = vld [vmem:[%s4024_s3 + $0x1e0] ss:$16 sps:$4 sm:$0xff]  }
 0x310   :  { %1462 = vmatpush2.bf16.msra.mxu1 %v2961_v50  ;;  %1503 = vmatpush2.bf16.msra.mxu0 %v2964_v51  ;;  %v1540_v50 = vsel %vm106_vm2, %v1536_v7, %v1532_v48  ;;  %v3503_v51 = vpack.c.b16 %v1538_v21, %v1538_v21  ;;  %v348_v7 = vrot.slane %v347_v34, 4  ;;  %v320_v48 = vrot.slane %v319_v37, 4  ;;  %v3047_v21 = vld [vmem:[%s4024_s3 + $0x1c4] ss:$16 sps:$4 sm:$0xff]  }
 0x311   :  { %1463 = vmatprep.subr.bf16.mxu1 %v2969_v1  ;;  %1504 = vmatprep.subr.bf16.mxu0 %v2972_v10  ;;  %v3002_v1 = vld [vmem:[%s4024_s3 + $0x2c4] ss:$16 sps:$4 sm:$0xff]   ;;  %v3509_v61 = vpack.c.b16 %v1540_v50, %v1540_v50  ;;  %v2997_v10 = vld [vmem:[%s4024_s3 + $0xc0] ss:$16 sps:$4 sm:$0xff]  }
 0x312   :  { %v3050_v50 = vld [vmem:[%s4024_s3 + $0x3c4] ss:$16 sps:$4 sm:$0xff]  }
 0x314   :  { %1464 = vmatpush2.bf16.msra.mxu1 %v2967_v2  ;;  %1505 = vmatpush2.bf16.msra.mxu0 %v2970_v13  ;;  %v3006_v2 = vld [vmem:[%s4024_s3 + $0x2a0] ss:$16 sps:$4 sm:$0xff]   ;;  %v3014_v13 = vld [vmem:[%s4024_s3 + $0x284] ss:$16 sps:$4 sm:$0xff]  }
 0x315   :  { %1465 = vmatprep.subr.bf16.mxu1 %v2975_v63  ;;  %1506 = vmatprep.subr.bf16.mxu0 %v2978_v14  ;;  %v3009_v63 = vld [vmem:[%s4024_s3 + $0x80] ss:$16 sps:$4 sm:$0xff]   ;;  %v3017_v14 = vld [vmem:[%s4024_s3 + $0x64] ss:$16 sps:$4 sm:$0xff]  }
 0x318   :  { %1466 = vmatpush2.bf16.msra.mxu1 %v2973_v16  ;;  %1507 = vmatpush2.bf16.msra.mxu0 %v2976_v11  ;;  %v3018_v16 = vld [vmem:[%s4024_s3 + $0x260] ss:$16 sps:$4 sm:$0xff]   ;;  %v3026_v11 = vld [vmem:[%s4024_s3 + $0x244] ss:$16 sps:$4 sm:$0xff]  }
 0x319   :  { %1467 = vmatprep.subr.bf16.mxu1 %v2981_v23  ;;  %1508 = vmatprep.subr.bf16.mxu0 %v2984_v22  ;;  %v3021_v23 = vld [vmem:[%s4024_s3 + $0x40] ss:$16 sps:$4 sm:$0xff]   ;;  %v3029_v22 = vld [vmem:[%s4024_s3 + $0x24] ss:$16 sps:$4 sm:$0xff]  }
 0x31c   :  { %1468 = vmatpush2.bf16.msra.mxu1 %v2979_v27  ;;  %1509 = vmatpush2.bf16.msra.mxu0 %v2982_v30  ;;  %v3030_v27 = vld [vmem:[%s4024_s3 + $0x220] ss:$16 sps:$4 sm:$0xff]   ;;  %v333_v30 = vmax.f32 %v3436_v52, %v3442_v55 }
 0x31d   :  { %1469 = vmatprep.subr.bf16.mxu1 %v2987_v31  ;;  %1510 = vmatprep.subr.bf16.mxu0 %v2990_v35  ;;  %v3038_v31 = vld [vmem:[%s4024_s3 + $0x204] ss:$16 sps:$4 sm:$0xff]   ;;  %v305_v35 = vmax.f32 %v3410_v42, %v3404_v40 }
 0x320   :  { %1470 = vmatpush2.bf16.msra.mxu1 %v2985_v38  ;;  %1511 = vmatpush2.bf16.msra.mxu0 %v2988_v19  ;;  %v3036_v38 = vld [vmem:[%s4024_s3 + $0x200] ss:$16 sps:$4 sm:$0xff]   ;;  %v334_v19 = vrot.slane %v333_v30, 4 }
 0x321   :  { %2189 = vmatprep.subr.bf16.mxu1 %v2993_v5  ;;  %2230 = vmatprep.subr.bf16.mxu0 %v2996_v47  ;;  %v3044_v5 = vld [vmem:[%s4024_s3 + $0x3e4] ss:$16 sps:$4 sm:$0xff]   ;;  %v306_v47 = vrot.slane %v305_v35, 4 }
 0x323   :  { %1472 = vmatmul.mubr.bf16.vlgmr.msra.gmra.mxu1 %v3470_v28  ;;  %1513 = vmatmul.mubr.bf16.vlgmr.msra.gmra.mxu0 %v3473_v32  ;;  %v3000_v28 = vld [vmem:[%s4024_s3 + $0x2c0] ss:$16 sps:$4 sm:$0xff]   ;;  %v3008_v32 = vld [vmem:[%s4024_s3 + $0x2a4] ss:$16 sps:$4 sm:$0xff]  }
 0x324   :  { %2190 = vmatpush1.bf16.msra.mxu1 %v2991_v6  ;;  %2221 = vmatprep.mubr.bf16.mxu1 %v3503_v51  ;;  %v3042_v6 = vld [vmem:[%s4024_s3 + $0x3e0] ss:$16 sps:$4 sm:$0xff]  }
 0x325   :  { %2231 = vmatpush1.bf16.msra.mxu0 %v2994_v49  ;;  %2262 = vmatprep.mubr.bf16.mxu0 %v3509_v61  ;;  %v335_v49 = vmax.f32 %v333_v30, %v334_v19  ;;  %v3069_v19 = vld [vmem:[%s4024_s3 + $0x140] ss:$16 sps:$4 sm:$0xff]  }
 0x326   :  { %2191 = vmatprep.subr.bf16.mxu1 %v2999_v8  ;;  %2232 = vmatprep.subr.bf16.mxu0 %v3002_v1  ;;  %v349_v8 = vmax.f32 %v347_v34, %v348_v7  ;;  %v307_v1 = vmax.f32 %v305_v35, %v306_v47  ;;  %v3066_v35 = vld [vmem:[%s4024_s3 + $0x360] ss:$16 sps:$4 sm:$0xff]   ;;  %v3077_v47 = vld [vmem:[%s4024_s3 + $0x124] ss:$16 sps:$4 sm:$0xff]  }
 0x327   :  { %v3072_v7 = vld [vmem:[%s4024_s3 + $0x340] ss:$16 sps:$4 sm:$0xff]  }
 0x328   :  { %2192 = vmatpush1.bf16.msra.mxu1 %v2997_v10  ;;  %v3045_v10 = vld [vmem:[%s4024_s3 + $0x1c0] ss:$16 sps:$4 sm:$0xff]  }
 0x329   :  { %2233 = vmatpush1.bf16.msra.mxu0 %v3000_v28  ;;  %2193 = vmatprep.subr.bf16.mxu1 %v3005_v12  ;;  %v321_v28 = vmax.f32 %v319_v37, %v320_v48  ;;  %v3048_v12 = vld [vmem:[%s4024_s3 + $0x3c0] ss:$16 sps:$4 sm:$0xff]   ;;  %v3074_v37 = vld [vmem:[%s4024_s3 + $0x344] ss:$16 sps:$4 sm:$0xff]  }
 0x32a   :  { %2234 = vmatprep.subr.bf16.mxu0 %v3008_v32  ;;  %v3053_v32 = vld [vmem:[%s4024_s3 + $0x1a4] ss:$16 sps:$4 sm:$0xff]  }
 0x32b   :  { %v3080_v48 = vld [vmem:[%s4024_s3 + $0x324] ss:$16 sps:$4 sm:$0xff]  }
 0x32c   :  { %2194 = vmatpush1.bf16.msra.mxu1 %v3003_v62  ;;  %v336_v62 = vrot.slane %v335_v49, 2 }
 0x32d   :  { %2235 = vmatpush1.bf16.msra.mxu0 %v3006_v2  ;;  %2195 = vmatprep.subr.bf16.mxu1 %v3011_v3  ;;  %v3056_v2 = vld [vmem:[%s4024_s3 + $0x3a4] ss:$16 sps:$4 sm:$0xff]   ;;  %v350_v3 = vrot.slane %v349_v8, 2 }
 0x32e   :  { %2236 = vmatprep.subr.bf16.mxu0 %v3014_v13  ;;  %v308_v13 = vrot.slane %v307_v1, 2 }
 0x330   :  { %2196 = vmatpush1.bf16.msra.mxu1 %v3009_v63  ;;  %v3051_v63 = vld [vmem:[%s4024_s3 + $0x1a0] ss:$16 sps:$4 sm:$0xff]  }
 0x331   :  { %2237 = vmatpush1.bf16.msra.mxu0 %v3012_v4  ;;  %2197 = vmatprep.subr.bf16.mxu1 %v3017_v14  ;;  %v322_v4 = vrot.slane %v321_v28, 2  ;;  %v3054_v14 = vld [vmem:[%s4024_s3 + $0x3a0] ss:$16 sps:$4 sm:$0xff]  }
 0x332   :  { %2238 = vmatprep.subr.bf16.mxu0 %v3020_v9  ;;  %v3059_v9 = vld [vmem:[%s4024_s3 + $0x184] ss:$16 sps:$4 sm:$0xff]  }
 0x334   :  { %2198 = vmatpush1.bf16.msra.mxu1 %v3015_v15  ;;  %v337_v15 = vmax.f32 %v335_v49, %v336_v62  ;;  %v3075_v49 = vld [vmem:[%s4024_s3 + $0x120] ss:$16 sps:$4 sm:$0xff]  }
 0x335   :  { %2239 = vmatpush1.bf16.msra.mxu0 %v3018_v16  ;;  %2199 = vmatprep.subr.bf16.mxu1 %v3023_v20  ;;  %v3062_v16 = vld [vmem:[%s4024_s3 + $0x384] ss:$16 sps:$4 sm:$0xff]   ;;  %v351_v20 = vmax.f32 %v349_v8, %v350_v3  ;;  %v3078_v8 = vld [vmem:[%s4024_s3 + $0x320] ss:$16 sps:$4 sm:$0xff]  }
 0x336   :  { %2240 = vmatprep.subr.bf16.mxu0 %v3026_v11  ;;  %v309_v11 = vmax.f32 %v307_v1, %v308_v13  ;;  %v3083_v1 = vld [vmem:[%s4024_s3 + $0x104] ss:$16 sps:$4 sm:$0xff]   ;;  %v3081_v62 = vld [vmem:[%s4024_s3 + $0x100] ss:$16 sps:$4 sm:$0xff]  }
 0x337   :  { %v3084_v3 = vld [vmem:[%s4024_s3 + $0x300] ss:$16 sps:$4 sm:$0xff]  }
 0x338   :  { %2200 = vmatpush1.bf16.msra.mxu1 %v3021_v23  ;;  %v3057_v23 = vld [vmem:[%s4024_s3 + $0x180] ss:$16 sps:$4 sm:$0xff]   ;;  %v310_v30 = vrot.slane %v309_v11, 1 }
 0x339   :  { %2241 = vmatpush1.bf16.msra.mxu0 %v3024_v24  ;;  %2201 = vmatprep.subr.bf16.mxu1 %v3029_v22  ;;  %v323_v24 = vmax.f32 %v321_v28, %v322_v4  ;;  %v3060_v22 = vld [vmem:[%s4024_s3 + $0x380] ss:$16 sps:$4 sm:$0xff]   ;;  %v3086_v28 = vld [vmem:[%s4024_s3 + $0x304] ss:$16 sps:$4 sm:$0xff]  }
 0x33a   :  { %2242 = vmatprep.subr.bf16.mxu0 %v3032_v25  ;;  %v3065_v25 = vld [vmem:[%s4024_s3 + $0x164] ss:$16 sps:$4 sm:$0xff]  }
 0x33b   :  { %v324_v34 = vrot.slane %v323_v24, 1 }
 0x33c   :  { %2202 = vmatpush1.bf16.msra.mxu1 %v3027_v26  ;;  %v338_v26 = vrot.slane %v337_v15, 1 }
 0x33d   :  { %2243 = vmatpush1.bf16.msra.mxu0 %v3030_v27  ;;  %2203 = vmatprep.subr.bf16.mxu1 %v3035_v29  ;;  %v3068_v27 = vld [vmem:[%s4024_s3 + $0x364] ss:$16 sps:$4 sm:$0xff]   ;;  %v352_v29 = vrot.slane %v351_v20, 1 }
 0x33e   :  { %2244 = vmatprep.subr.bf16.mxu0 %v3038_v31  ;;  %v3063_v31 = vld [vmem:[%s4024_s3 + $0x160] ss:$16 sps:$4 sm:$0xff]  }
 0x340   :  { %2204 = vmatpush1.bf16.msra.mxu1 %v3033_v36  ;;  %v3071_v36 = vld [vmem:[%s4024_s3 + $0x144] ss:$16 sps:$4 sm:$0xff]  }
 0x341   :  { %2245 = vmatpush1.bf16.msra.mxu0 %v3036_v38  ;;  %2205 = vmatprep.subr.bf16.mxu1 %v3041_v39  ;;  %v339_v38 = vmax.f32 %v337_v15, %v338_v26  ;;  %v353_v39 = vmax.f32 %v351_v20, %v352_v29  ;;  %v3087_v15 = vld [vmem:[%s4024_s3 + $0xe8] ss:$16 sps:$4 sm:$0xff]   ;;  %v3101_v26 = vld [vmem:[%s4024_s3 + $0xac] ss:$16 sps:$4 sm:$0xff]  }
 0x342   :  { %2246 = vmatprep.subr.bf16.mxu0 %v3044_v5  ;;  %v311_v5 = vmax.f32 %v309_v11, %v310_v30  ;;  %v3090_v20 = vld [vmem:[%s4024_s3 + $0x2e8] ss:$16 sps:$4 sm:$0xff]   ;;  %v3110_v30 = vld [vmem:[%s4024_s3 + $0x28c] ss:$16 sps:$4 sm:$0xff]  }
 0x343   :  { %v3102_v29 = vld [vmem:[%s4024_s3 + $0x2a8] ss:$16 sps:$4 sm:$0xff]  }
 0x344   :  { %2206 = vmatpush2.bf16.msra.mxu1 %v3039_v18  ;;  %v325_v18 = vmax.f32 %v323_v24, %v324_v34  ;;  %v3098_v24 = vld [vmem:[%s4024_s3 + $0x2cc] ss:$16 sps:$4 sm:$0xff]   ;;  %v3108_v34 = vld [vmem:[%s4024_s3 + $0x288] ss:$16 sps:$4 sm:$0xff]  }
 0x345   :  { %2247 = vmatpush2.bf16.msra.mxu0 %v3042_v6  ;;  %2207 = vmatprep.subr.bf16.mxu1 %v3047_v21  ;;  %v421_v6 = vpack.c.bf16 %v339_v38, %v339_v38  ;;  %v423_v21 = vpack.c.bf16 %v353_v39, %v353_v39  ;;  %v3114_v38 = vld [vmem:[%s4024_s3 + $0x268] ss:$16 sps:$4 sm:$0xff]   ;;  %v3119_v39 = vld [vmem:[%s4024_s3 + $0x4c] ss:$16 sps:$4 sm:$0xff]  }
 0x346   :  { %2248 = vmatprep.subr.bf16.mxu0 %v3050_v50  ;;  %v417_v50 = vpack.c.bf16 %v311_v5, %v311_v5  ;;  %v3117_v5 = vld [vmem:[%s4024_s3 + $0x48] ss:$16 sps:$4 sm:$0xff]  }
 0x348   :  { %2208 = vmatpush2.bf16.msra.mxu1 %v3045_v10  ;;  %v419_v10 = vpack.c.bf16 %v325_v18, %v325_v18  ;;  %v3128_v18 = vld [vmem:[%s4024_s3 + $0x22c] ss:$16 sps:$4 sm:$0xff]  }
 0x349   :  { %2249 = vmatpush2.bf16.msra.mxu0 %v3048_v12  ;;  %2209 = vmatprep.subr.bf16.mxu1 %v3053_v32  ;;  %v1533_v12 = vunpack.c.l.b16 %v421_v6  ;;  %v1535_v32 = vunpack.c.l.b16 %v423_v21  ;;  %v3126_v6 = vld [vmem:[%s4024_s3 + $0x228] ss:$16 sps:$4 sm:$0xff]   ;;  %v3131_v21 = vld [vmem:[%s4024_s3 + $0xc] ss:$16 sps:$4 sm:$0xff]  }
 0x34a   :  { %2250 = vmatprep.subr.bf16.mxu0 %v3056_v2  ;;  %v1529_v2 = vunpack.c.l.b16 %v417_v50  ;;  %v1531_v13 = vunpack.c.l.b16 %v419_v10  ;;  %v3129_v50 = vld [vmem:[%s4024_s3 + $0x8] ss:$16 sps:$4 sm:$0xff]   ;;  %v3140_v10 = vld [vmem:[%s4024_s3 + $0x3ec] ss:$16 sps:$4 sm:$0xff]  }
 0x34c   :  { %2210 = vmatpush2.bf16.msra.mxu1 %v3051_v63  ;;  %v3089_v63 = vld [vmem:[%s4024_s3 + $0xec] ss:$16 sps:$4 sm:$0xff]   ;;  %v1537_v4 = vsel %vm106_vm2, %v1533_v12, %v1529_v2  ;;  %v3138_v12 = vld [vmem:[%s4024_s3 + $0x3e8] ss:$16 sps:$4 sm:$0xff]  }
 0x34d   :  { %2251 = vmatpush2.bf16.msra.mxu0 %v3054_v14  ;;  %2211 = vmatprep.subr.bf16.mxu1 %v3059_v9  ;;  %v3092_v14 = vld [vmem:[%s4024_s3 + $0x2ec] ss:$16 sps:$4 sm:$0xff]   ;;  %v1539_v9 = vsel %vm106_vm2, %v1535_v32, %v1531_v13  ;;  %v3141_v2 = vld [vmem:[%s4024_s3 + $0x1c8] ss:$16 sps:$4 sm:$0xff]  }
 0x34e   :  { %2252 = vmatprep.subr.bf16.mxu0 %v3062_v16  ;;  %v3706_v16 = vpack.c.b16 %v1537_v4, %v1537_v4  ;;  %v3711_v11 = vpack.c.b16 %v1539_v9, %v1539_v9  ;;  %v3143_v32 = vld [vmem:[%s4024_s3 + $0x1cc] ss:$16 sps:$4 sm:$0xff]   ;;  %v3147_v4 = vld [vmem:[%s4024_s3 + $0x1a8] ss:$16 sps:$4 sm:$0xff]  }
 0x34f   :  { %v3149_v13 = vld [vmem:[%s4024_s3 + $0x1ac] ss:$16 sps:$4 sm:$0xff]  }
 0x350   :  { %2212 = vmatpush2.bf16.msra.mxu1 %v3057_v23  ;;  %v3095_v23 = vld [vmem:[%s4024_s3 + $0xcc] ss:$16 sps:$4 sm:$0xff]  }
 0x351   :  { %2253 = vmatpush2.bf16.msra.mxu0 %v3060_v22  ;;  %2213 = vmatprep.subr.bf16.mxu1 %v3065_v25  ;;  %v3093_v22 = vld [vmem:[%s4024_s3 + $0xc8] ss:$16 sps:$4 sm:$0xff]   ;;  %v3155_v9 = vld [vmem:[%s4024_s3 + $0x18c] ss:$16 sps:$4 sm:$0xff]  }
 0x352   :  { %2254 = vmatprep.subr.bf16.mxu0 %v3068_v27  ;;  %v3096_v25 = vld [vmem:[%s4024_s3 + $0x2c8] ss:$16 sps:$4 sm:$0xff]   ;;  %v3104_v27 = vld [vmem:[%s4024_s3 + $0x2ac] ss:$16 sps:$4 sm:$0xff]  }
 0x354   :  { %2214 = vmatpush2.bf16.msra.mxu1 %v3063_v31  ;;  %v3105_v31 = vld [vmem:[%s4024_s3 + $0x88] ss:$16 sps:$4 sm:$0xff]  }
 0x355   :  { %2255 = vmatpush2.bf16.msra.mxu0 %v3066_v35  ;;  %2215 = vmatprep.subr.bf16.mxu1 %v3071_v36  ;;  %v3113_v35 = vld [vmem:[%s4024_s3 + $0x6c] ss:$16 sps:$4 sm:$0xff]  }
 0x356   :  { %2256 = vmatprep.subr.bf16.mxu0 %v3074_v37  ;;  %v3116_v36 = vld [vmem:[%s4024_s3 + $0x26c] ss:$16 sps:$4 sm:$0xff]   ;;  %v3111_v37 = vld [vmem:[%s4024_s3 + $0x68] ss:$16 sps:$4 sm:$0xff]  }
 0x358   :  { %2216 = vmatpush2.bf16.msra.mxu1 %v3069_v19  ;;  %v3122_v19 = vld [vmem:[%s4024_s3 + $0x24c] ss:$16 sps:$4 sm:$0xff]  }
 0x359   :  { %2257 = vmatpush2.bf16.msra.mxu0 %v3072_v7  ;;  %2217 = vmatprep.subr.bf16.mxu1 %v3077_v47  ;;  %v3120_v7 = vld [vmem:[%s4024_s3 + $0x248] ss:$16 sps:$4 sm:$0xff]   ;;  %v3125_v47 = vld [vmem:[%s4024_s3 + $0x2c] ss:$16 sps:$4 sm:$0xff]  }
 0x35a   :  { %2258 = vmatprep.subr.bf16.mxu0 %v3080_v48  ;;  %v3123_v48 = vld [vmem:[%s4024_s3 + $0x28] ss:$16 sps:$4 sm:$0xff]  }
 0x35c   :  { %2218 = vmatpush2.bf16.msra.mxu1 %v3075_v49  ;;  %v3134_v49 = vld [vmem:[%s4024_s3 + $0x20c] ss:$16 sps:$4 sm:$0xff]  }
 0x35d   :  { %2259 = vmatpush2.bf16.msra.mxu0 %v3078_v8  ;;  %2219 = vmatprep.subr.bf16.mxu1 %v3083_v1  ;;  %v3132_v8 = vld [vmem:[%s4024_s3 + $0x208] ss:$16 sps:$4 sm:$0xff]   ;;  %v3137_v1 = vld [vmem:[%s4024_s3 + $0x1ec] ss:$16 sps:$4 sm:$0xff]  }
 0x35e   :  { %2260 = vmatprep.subr.bf16.mxu0 %v3086_v28  ;;  %v3135_v28 = vld [vmem:[%s4024_s3 + $0x1e8] ss:$16 sps:$4 sm:$0xff]  }
 0x360   :  { %2220 = vmatpush2.bf16.msra.mxu1 %v3081_v62  ;;  %v3146_v62 = vld [vmem:[%s4024_s3 + $0x3cc] ss:$16 sps:$4 sm:$0xff]  }
 0x361   :  { %2261 = vmatpush2.bf16.msra.mxu0 %v3084_v3  ;;  %2271 = vmatprep.subr.bf16.mxu1 %v3089_v63  ;;  %v3144_v3 = vld [vmem:[%s4024_s3 + $0x3c8] ss:$16 sps:$4 sm:$0xff]   ;;  %v3152_v63 = vld [vmem:[%s4024_s3 + $0x3ac] ss:$16 sps:$4 sm:$0xff]  }
 0x362   :  { %2312 = vmatprep.subr.bf16.mxu0 %v3092_v14  ;;  %v3150_v14 = vld [vmem:[%s4024_s3 + $0x3a8] ss:$16 sps:$4 sm:$0xff]  }
 0x363   :  { %2222 = vmatmul.mubr.bf16.vlgmr.msra.gmra.mxu1 %v3706_v16 }
 0x364   :  { %2263 = vmatmul.mubr.bf16.vlgmr.msra.gmra.mxu0 %v3711_v11  ;;  %2272 = vmatpush1.bf16.msra.mxu1 %v3087_v15  ;;  %v3158_v15 = vld [vmem:[%s4024_s3 + $0x38c] ss:$16 sps:$4 sm:$0xff]  }
 0x365   :  { %2303 = vmatprep.mubr.bf16.mxu1 %v3503_v51  ;;  %2313 = vmatpush1.bf16.msra.mxu0 %v3090_v20  ;;  %v3099_v51 = vld [vmem:[%s4024_s3 + $0xa8] ss:$16 sps:$4 sm:$0xff]  }
 0x366   :  { %2344 = vmatprep.mubr.bf16.mxu0 %v3509_v61  ;;  %2273 = vmatprep.subr.bf16.mxu1 %v3095_v23  ;;  %v3107_v61 = vld [vmem:[%s4024_s3 + $0x8c] ss:$16 sps:$4 sm:$0xff]   ;;  %v3153_v20 = vld [vmem:[%s4024_s3 + $0x188] ss:$16 sps:$4 sm:$0xff]  }
 0x367   :  { %2314 = vmatprep.subr.bf16.mxu0 %v3098_v24  ;;  %v3156_v23 = vld [vmem:[%s4024_s3 + $0x388] ss:$16 sps:$4 sm:$0xff]   ;;  %v3161_v24 = vld [vmem:[%s4024_s3 + $0x16c] ss:$16 sps:$4 sm:$0xff]  }
 0x368   :  { %2274 = vmatpush1.bf16.msra.mxu1 %v3093_v22  ;;  %v3164_v22 = vld [vmem:[%s4024_s3 + $0x36c] ss:$16 sps:$4 sm:$0xff]  }
 0x369   :  { %2315 = vmatpush1.bf16.msra.mxu0 %v3096_v25  ;;  %2275 = vmatprep.subr.bf16.mxu1 %v3101_v26  ;;  %v3159_v25 = vld [vmem:[%s4024_s3 + $0x168] ss:$16 sps:$4 sm:$0xff]  }
 0x36a   :  { %2316 = vmatprep.subr.bf16.mxu0 %v3104_v27  ;;  %v3162_v26 = vld [vmem:[%s4024_s3 + $0x368] ss:$16 sps:$4 sm:$0xff]   ;;  %v3167_v27 = vld [vmem:[%s4024_s3 + $0x14c] ss:$16 sps:$4 sm:$0xff]  }
 0x36c   :  { %2276 = vmatpush1.bf16.msra.mxu1 %v3099_v51  ;;  %v3170_v51 = vld [vmem:[%s4024_s3 + $0x34c] ss:$16 sps:$4 sm:$0xff]  }
 0x36d   :  { %2317 = vmatpush1.bf16.msra.mxu0 %v3102_v29  ;;  %2277 = vmatprep.subr.bf16.mxu1 %v3107_v61  ;;  %v3165_v29 = vld [vmem:[%s4024_s3 + $0x148] ss:$16 sps:$4 sm:$0xff]  }
 0x36e   :  { %2318 = vmatprep.subr.bf16.mxu0 %v3110_v30  ;;  %v3168_v61 = vld [vmem:[%s4024_s3 + $0x348] ss:$16 sps:$4 sm:$0xff]   ;;  %v3173_v30 = vld [vmem:[%s4024_s3 + $0x12c] ss:$16 sps:$4 sm:$0xff]  }
 0x370   :  { %2278 = vmatpush1.bf16.msra.mxu1 %v3105_v31  ;;  %v3176_v31 = vld [vmem:[%s4024_s3 + $0x32c] ss:$16 sps:$4 sm:$0xff]  }
 0x371   :  { %2319 = vmatpush1.bf16.msra.mxu0 %v3108_v34  ;;  %2279 = vmatprep.subr.bf16.mxu1 %v3113_v35  ;;  %v3171_v34 = vld [vmem:[%s4024_s3 + $0x128] ss:$16 sps:$4 sm:$0xff]  }
 0x372   :  { %2320 = vmatprep.subr.bf16.mxu0 %v3116_v36  ;;  %v3174_v35 = vld [vmem:[%s4024_s3 + $0x328] ss:$16 sps:$4 sm:$0xff]   ;;  %v3179_v36 = vld [vmem:[%s4024_s3 + $0x10c] ss:$16 sps:$4 sm:$0xff]  }
 0x374   :  { %2280 = vmatpush1.bf16.msra.mxu1 %v3111_v37  ;;  %v3182_v37 = vld [vmem:[%s4024_s3 + $0x30c] ss:$16 sps:$4 sm:$0xff]  }
 0x375   :  { %2321 = vmatpush1.bf16.msra.mxu0 %v3114_v38  ;;  %2281 = vmatprep.subr.bf16.mxu1 %v3119_v39  ;;  %v3177_v38 = vld [vmem:[%s4024_s3 + $0x108] ss:$16 sps:$4 sm:$0xff]  }
 0x376   :  { %2322 = vmatprep.subr.bf16.mxu0 %v3122_v19  ;;  %v3180_v39 = vld [vmem:[%s4024_s3 + $0x308] ss:$16 sps:$4 sm:$0xff]  }
 0x378   :  { %2282 = vmatpush1.bf16.msra.mxu1 %v3117_v5 }
 0x379   :  { %2323 = vmatpush1.bf16.msra.mxu0 %v3120_v7  ;;  %2283 = vmatprep.subr.bf16.mxu1 %v3125_v47 }
 0x37a   :  { %2324 = vmatprep.subr.bf16.mxu0 %v3128_v18 }
 0x37c   :  { %2284 = vmatpush1.bf16.msra.mxu1 %v3123_v48 }
 0x37d   :  { %2325 = vmatpush1.bf16.msra.mxu0 %v3126_v6  ;;  %2285 = vmatprep.subr.bf16.mxu1 %v3131_v21 }
 0x37e   :  { %2326 = vmatprep.subr.bf16.mxu0 %v3134_v49 }
 0x380   :  { %2286 = vmatpush1.bf16.msra.mxu1 %v3129_v50 }
 0x381   :  { %2327 = vmatpush1.bf16.msra.mxu0 %v3132_v8  ;;  %2287 = vmatprep.subr.bf16.mxu1 %v3137_v1 }
 0x382   :  { %2328 = vmatprep.subr.bf16.mxu0 %v3140_v10 }
 0x384   :  { %2288 = vmatpush2.bf16.msra.mxu1 %v3135_v28 }
 0x385   :  { %2329 = vmatpush2.bf16.msra.mxu0 %v3138_v12  ;;  %2289 = vmatprep.subr.bf16.mxu1 %v3143_v32 }
 0x386   :  { %2330 = vmatprep.subr.bf16.mxu0 %v3146_v62 }
 0x388   :  { %2290 = vmatpush2.bf16.msra.mxu1 %v3141_v2 }
 0x389   :  { %2331 = vmatpush2.bf16.msra.mxu0 %v3144_v3  ;;  %2291 = vmatprep.subr.bf16.mxu1 %v3149_v13 }
 0x38a   :  { %2332 = vmatprep.subr.bf16.mxu0 %v3152_v63 }
 0x38c   :  { %2292 = vmatpush2.bf16.msra.mxu1 %v3147_v4  ;;  %v2354_v4 = vstv %s4026_s5 }
 0x38d   :  { %2333 = vmatpush2.bf16.msra.mxu0 %v3150_v14  ;;  %2293 = vmatprep.subr.bf16.mxu1 %v3155_v9 }
 0x38e   :  { %2334 = vmatprep.subr.bf16.mxu0 %v3158_v15 }
 0x390   :  { %2294 = vmatpush2.bf16.msra.mxu1 %v3153_v20 }
 0x391   :  { %2335 = vmatpush2.bf16.msra.mxu0 %v3156_v23  ;;  %2295 = vmatprep.subr.bf16.mxu1 %v3161_v24 }
 0x392   :  { %2336 = vmatprep.subr.bf16.mxu0 %v3164_v22 }
 0x394   :  { %2296 = vmatpush2.bf16.msra.mxu1 %v3159_v25 }
 0x395   :  { %2337 = vmatpush2.bf16.msra.mxu0 %v3162_v26  ;;  %2297 = vmatprep.subr.bf16.mxu1 %v3167_v27 }
 0x396   :  { %2338 = vmatprep.subr.bf16.mxu0 %v3170_v51 }
 0x398   :  { %2298 = vmatpush2.bf16.msra.mxu1 %v3165_v29 }
 0x399   :  { %2339 = vmatpush2.bf16.msra.mxu0 %v3168_v61  ;;  %2299 = vmatprep.subr.bf16.mxu1 %v3173_v30 }
 0x39a   :  { %2340 = vmatprep.subr.bf16.mxu0 %v3176_v31 }
 0x39c   :  { %2300 = vmatpush2.bf16.msra.mxu1 %v3171_v34 }
 0x39d   :  { %2341 = vmatpush2.bf16.msra.mxu0 %v3174_v35  ;;  %2301 = vmatprep.subr.bf16.mxu1 %v3179_v36 }
 0x39e   :  { %2342 = vmatprep.subr.bf16.mxu0 %v3182_v37 }
 0x3a0   :  { %2302 = vmatpush2.bf16.msra.mxu1 %v3177_v38 }
 0x3a1   :  { %2343 = vmatpush2.bf16.msra.mxu0 %v3180_v39 }
 0x3a3   :  { %2304 = vmatmul.mubr.bf16.vlgmr.msra.gmra.mxu1 %v3706_v16  ;;  %v1391_v19 = vpop.f32.mrf.mxu1  ;;  %v1432_v5 = vpop.f32.mrf.mxu0 }
 0x3a4   :  { %2345 = vmatmul.mubr.bf16.vlgmr.msra.gmra.mxu0 %v3711_v11  ;;  %v1433_v7 = vadd.f32 %v1432_v5, %v1391_v19 }
 0x3a5   :  { %v1393_v47 = vpop.f32.mrf.mxu1  ;;  %v1434_v18 = vpop.f32.mrf.mxu0 }
 0x3a6   :  { %v1435_v48 = vadd.f32 %v1434_v18, %v1393_v47 }
 0x3a7   :  { %v1395_v6 = vpop.f32.mrf.mxu1  ;;  %v1436_v21 = vpop.f32.mrf.mxu0 }
 0x3a9   :  { %v1396_v49 = vpop.f32.mrf.mxu1  ;;  %v1437_v50 = vpop.f32.mrf.mxu0 }
 0x3e3   :  { %v1473_v8 = vpop.f32.mrf.mxu1  ;;  %v1514_v1 = vpop.f32.mrf.mxu0 }
 0x3e4   :  { %v1515_v10 = vadd.f32 %v1514_v1, %v1473_v8 }
 0x3e5   :  { %v1475_v28 = vpop.f32.mrf.mxu1  ;;  %v1516_v12 = vpop.f32.mrf.mxu0 }
 0x3e6   :  { %v1517_v32 = vadd.f32 %v1516_v12, %v1475_v28 }
 0x3e7   :  { %v1477_v62 = vpop.f32.mrf.mxu1  ;;  %v1518_v16 = vpop.f32.mrf.mxu0 }
 0x3e9   :  { %v1478_v2 = vpop.f32.mrf.mxu1  ;;  %v1519_v3 = vpop.f32.mrf.mxu0 }
 0x423   :  { %v2223_v11 = vpop.f32.mrf.mxu1 }
 0x424   :  { %v2224_v13 = vadd.f32 %v2223_v11, %v1433_v7  ;;  %v2264_v63 = vpop.f32.mrf.mxu0  ;;  %v3246_v11 = vmov 1966171168  }
 0x425   :  { %v2225_v14 = vpop.f32.mrf.mxu1 }
 0x426   :  { %v2265_v9 = vadd.f32 %v2264_v63, %v2224_v13  ;;  %v2226_v15 = vadd.f32 %v2225_v14, %v1435_v48  ;;  %v2266_v20 = vpop.f32.mrf.mxu0 }
 0x427   :  { %v2227_v23 = vpop.f32.mrf.mxu1 }
 0x428   :  { %v2355_v24 = vadd.f32 %v2354_v4, %v2265_v9  ;;  %v2267_v22 = vadd.f32 %v2266_v20, %v2226_v15  ;;  %v2268_v25 = vpop.f32.mrf.mxu0  ;;  %v2429_v23 = vsub.s32 2, %v3387_v33 }
 0x429   :  { %v2228_v26 = vpop.f32.mrf.mxu1 }
 0x42a   :  { %v2772_v27 = vmul.f32 -1.442695, %v2355_v24  ;;  %v2356_v51 = vadd.f32 %v2354_v4, %v2267_v22  ;;  %v2269_v29 = vpop.f32.mrf.mxu0  ;;  %v2433_v24 = vsub.s32 3, %v3387_v33 }
 0x42c   :  { %3187 = vpow2.f32 %v2772_v27  ;;  %v2773_v61 = vmul.f32 -1.442695, %v2356_v51 }
 0x42e   :  { %3189 = vpow2.f32 %v2773_v61 }
 0x439   :  { %v3188_v30 = vpop.eup %3187 }
 0x43a   :  { %v2371_v31 = vadd.f32 1.0, %v3188_v30 }
 0x43b   :  { %v3190_v34 = vpop.eup %3189 }
 0x43c   :  { %v2372_v35 = vadd.f32 1.0, %v3190_v34  ;;  %3191 = vrcp.f32 %v2371_v31 }
 0x43e   :  { %3193 = vrcp.f32 %v2372_v35 }
 0x449   :  { %v3192_v36 = vpop.eup %3191 }
 0x44b   :  { %v3194_v37 = vpop.eup %3193 }
 0x44c   :  { %v2387_v38 = vcombine.low %v3192_v36, %v3194_v37 }
 0x463   :  { %v2305_v39 = vpop.f32.mrf.mxu1 }
 0x464   :  { %v2306_v19 = vadd.f32 %v2305_v39, %v1515_v10  ;;  %v2346_v5 = vpop.f32.mrf.mxu0 }
 0x465   :  { %v2307_v7 = vpop.f32.mrf.mxu1 }
 0x466   :  { %v2347_v47 = vadd.f32 %v2346_v5, %v2306_v19  ;;  %v2308_v18 = vadd.f32 %v2307_v7, %v1517_v32  ;;  %v2348_v48 = vpop.f32.mrf.mxu0  ;;  %v2390_v32 = vunpack.c.l.s4 %v3246_v11 }
 0x467   :  { %v2309_v6 = vpop.f32.mrf.mxu1 }
 0x468   :  { %v2357_v21 = vadd.f32 %v2354_v4, %v2347_v47  ;;  %v2349_v49 = vadd.f32 %v2348_v48, %v2308_v18  ;;  %v2350_v50 = vpop.f32.mrf.mxu0  ;;  %v2391_v13 = vunpack.c.0.s8 %v2390_v32  ;;  %v3208_v18 = vld [vmem:[%s4021_s0 + $0x28] sm:$0xff]  ;;  %v3209_v6 = vld [vmem:[%s4021_s0 + $0x30] sm:$0xff] }
 0x469   :  { %v2310_v8 = vpop.f32.mrf.mxu1  ;;  %v3216_v32 = vld [vmem:[%s4021_s0 + $0x68] sm:$0xff] }
 0x46a   :  { %v2774_v1 = vmul.f32 -1.442695, %v2357_v21  ;;  %v2358_v28 = vadd.f32 %v2354_v4, %v2349_v49  ;;  %v2351_v12 = vpop.f32.mrf.mxu0  ;;  %v2394_v14 = vsub.s32 %v2391_v13, %v3387_v33  ;;  %v3210_v49 = vld [vmem:[%s4021_s0 + $0x38] sm:$0xff]  ;;  %v3211_v8 = vld [vmem:[%s4021_s0 + $0x40] sm:$0xff] }
 0x46c   :  { %3195 = vpow2.f32 %v2774_v1  ;;  %v2775_v62 = vmul.f32 -1.442695, %v2358_v28  ;;  %v2395_v20 = vrot.slane %v2387_v38, %v2394_v14  ;;  %v3212_v28 = vld [vmem:[%s4021_s0 + $0x48] sm:$0xff] }
 0x46e   :  { %3197 = vpow2.f32 %v2775_v62  ;;  %v3213_v62 = vld [vmem:[%s4021_s0 + $0x50] sm:$0xff] }
 0x479   :  { %v3196_v16 = vpop.eup %3195 }
 0x47a   :  { %v2373_v2 = vadd.f32 1.0, %v3196_v16 }
 0x47b   :  { %v3198_v3 = vpop.eup %3197 }
 0x47c   :  { %v2374_v10 = vadd.f32 1.0, %v3198_v3  ;;  %3199 = vrcp.f32 %v2373_v2  ;;  %v3214_v2 = vld [vmem:[%s4021_s0 + $0x58] sm:$0xff] }
 0x47e   :  { %3201 = vrcp.f32 %v2374_v10  ;;  %v3215_v10 = vld [vmem:[%s4021_s0 + $0x60] sm:$0xff] }
 0x489   :  { %v3200_v63 = vpop.eup %3199 }
 0x48b   :  { %v3202_v9 = vpop.eup %3201 }
 0x48c   :  { %v2388_v15 = vcombine.low %v3200_v63, %v3202_v9  ;;  %v3217_v63 = vld [vmem:[%s4021_s0 + $0x70] sm:$0xff]  ;;  %v3218_v9 = vld [vmem:[%s4021_s0 + $0x78] sm:$0xff] }
 0x48e   :  { %v2402_v4 = vrot.slane %v2388_v15, %v2394_v14 }
 0x490   :  { %v2403_v22 = vcombine.low %v2395_v20, %v2402_v4  ;;  %v2404_v25 = vcombine.high %v2395_v20, %v2402_v4 }
 0x492   :  { %v2411_v26 = vrot.slane %v2403_v22, %v2394_v14  ;;  %v2418_v27 = vrot.slane %v2404_v25, %v2394_v14 }
 0x494   :  { %v2422_v51 = vrot.slane %v2411_v26, %v3396_v54  ;;  %v2426_v29 = vrot.slane %v2411_v26, %v3400_v57  ;;  %v2430_v61 = vrot.slane %v2411_v26, %v2429_v23  ;;  %v2434_v30 = vrot.slane %v2411_v26, %v2433_v24 }
 0x495   :  { %v2438_v31 = vrot.slane %v2418_v27, %v3396_v54  ;;  %v2442_v34 = vrot.slane %v2418_v27, %v3400_v57  ;;  %v2446_v35 = vrot.slane %v2418_v27, %v2429_v23  ;;  %v2450_v36 = vrot.slane %v2418_v27, %v2433_v24 }
 0x496   :  { %v2459_v37 = vmul.f32 %v2422_v51, %v3410_v42  ;;  %v2460_v33 = vmul.f32 %v2426_v29, %v3419_v45  ;;  %v2461_v38 = vmul.f32 %v2430_v61, %v3413_v43  ;;  %v2462_v39 = vmul.f32 %v2434_v30, %v3425_v17 }
 0x497   :  { %v2463_v19 = vmul.f32 %v2422_v51, %v3404_v40  ;;  %v2464_v5 = vmul.f32 %v2426_v29, %v3416_v44  ;;  %v2465_v7 = vmul.f32 %v2430_v61, %v3407_v41  ;;  %v2466_v54 = vmul.f32 %v2434_v30, %v3422_v46  ;;  %v3203_v41 = vld [vmem:[%s4021_s0] sm:$0xff] }
 0x498   :  { %v2467_v57 = vmul.f32 %v2438_v31, %v3436_v52  ;;  %v2468_v47 = vmul.f32 %v2442_v34, %v3439_v53  ;;  %v2469_v42 = vmul.f32 %v2446_v35, %v3448_v58  ;;  %v2470_v45 = vmul.f32 %v2450_v36, %v3451_v59  ;;  %v3204_v52 = vld [vmem:[%s4021_s0 + $0x8] sm:$0xff] }
 0x499   :  { %v2471_v43 = vmul.f32 %v2438_v31, %v3442_v55  ;;  %v2472_v17 = vmul.f32 %v2442_v34, %v3445_v56  ;;  %v2473_v40 = vmul.f32 %v2446_v35, %v3454_v60  ;;  %v2474_v44 = vmul.f32 %v2450_v36, %v3457_v0  ;;  %v3205_v55 = vld [vmem:[%s4021_s0 + $0x10] sm:$0xff]  ;;  %v3206_v56 = vld [vmem:[%s4021_s0 + $0x18] sm:$0xff]  ;;  %v3207_v60 = vld [vmem:[%s4021_s0 + $0x20] sm:$0xff] }
 0x49a   :  { %v2475_v46 = vmul.f32 %v3203_v41, %v2459_v37  ;;  %v2476_v53 = vmul.f32 %v3204_v52, %v2460_v33  ;;  %v2477_v58 = vmul.f32 %v3205_v55, %v2461_v38  ;;  %v2478_v59 = vmul.f32 %v3206_v56, %v2462_v39 }
 0x49b   :  { %v2479_v0 = vmul.f32 %v3207_v60, %v2463_v19  ;;  %v2480_v48 = vmul.f32 %v3208_v18, %v2464_v5  ;;  %v2481_v21 = vmul.f32 %v3209_v6, %v2465_v7  ;;  %v2482_v50 = vmul.f32 %v3210_v49, %v2466_v54 }
 0x49c   :  { %v2483_v1 = vmul.f32 %v3211_v8, %v2467_v57  ;;  %v2484_v12 = vmul.f32 %v3212_v28, %v2468_v47  ;;  %v2485_v16 = vmul.f32 %v3213_v62, %v2469_v42  ;;  %v2486_v3 = vmul.f32 %v3214_v2, %v2470_v45  ;;  %2491 = vst [vmem:[%s4027_s6] sm:$0xff] %v2475_v46 }
 0x49d   :  { %2492 = vst [vmem:[%s4027_s6 + $0x8] sm:$0xff] %v2476_v53  ;;  %2493 = vst [vmem:[%s4027_s6 + $0x10] sm:$0xff] %v2477_v58  ;;  %v2487_v11 = vmul.f32 %v3215_v10, %v2471_v43  ;;  %v2488_v13 = vmul.f32 %v3216_v32, %v2472_v17  ;;  %v2489_v14 = vmul.f32 %v3217_v63, %v2473_v40 }
 0x49e   :  { %2494 = vst [vmem:[%s4027_s6 + $0x18] sm:$0xff] %v2478_v59  ;;  %v2490_v15 = vmul.f32 %v3218_v9, %v2474_v44  ;;  %2495 = vst [vmem:[%s4027_s6 + $0x20] sm:$0xff] %v2479_v0 }
 0x49f   :  { %2496 = vst [vmem:[%s4027_s6 + $0x28] sm:$0xff] %v2480_v48  ;;  %2497 = vst [vmem:[%s4027_s6 + $0x30] sm:$0xff] %v2481_v21 }
 0x4a0   :  { %2498 = vst [vmem:[%s4027_s6 + $0x38] sm:$0xff] %v2482_v50  ;;  %2499 = vst [vmem:[%s4027_s6 + $0x40] sm:$0xff] %v2483_v1 }
 0x4a1   :  { %2500 = vst [vmem:[%s4027_s6 + $0x48] sm:$0xff] %v2484_v12  ;;  %2501 = vst [vmem:[%s4027_s6 + $0x50] sm:$0xff] %v2485_v16 }
 0x4a2   :  { %2502 = vst [vmem:[%s4027_s6 + $0x58] sm:$0xff] %v2486_v3  ;;  %2503 = vst [vmem:[%s4027_s6 + $0x60] sm:$0xff] %v2487_v11 }
 0x4a3   :  { %2504 = vst [vmem:[%s4027_s6 + $0x68] sm:$0xff] %v2488_v13  ;;  %2505 = vst [vmem:[%s4027_s6 + $0x70] sm:$0xff] %v2489_v14 }
 0x4a4   :  { %2506 = vst [vmem:[%s4027_s6 + $0x78] sm:$0xff] %v2490_v15 }
 0x4a5   :  { %2511 = vsyncpa [#allocation4], 1 }

</bundles_post_ra>
